<compile_context>
chip_gen: v5e
topology: v5e:2x2
jax: 0.10.0
libtpu: 0.0.40
codegen_flags: <defaults>
</compile_context>

<pallas_src>
import functools

import jax
import jax.numpy as jnp
from jax.experimental import pallas as pl
from jax.experimental.pallas import tpu as pltpu


# ----------------------------- kernel ---------------------------------------


def _layernorm(x, gamma, beta, eps=1e-12):
    mean = jnp.mean(x, axis=-1, keepdims=True)
    var = jnp.mean(jnp.square(x - mean), axis=-1, keepdims=True)
    inv = jax.lax.rsqrt(var + eps)
    return (x - mean) * inv * gamma + beta


def fused_encoder_kernel(num_heads,
                         x_ref, mask_ref, embg_ref, embb_ref,
                         wqkv_ref, bqkv_ref, wo_ref, bo_ref,
                         g1_ref, be1_ref, w1_ref, fb1_ref,
                         w2_ref, fb2_ref, g2_ref, be2_ref,
                         out_ref):
    layer = pl.program_id(1)

    # Prologue (first layer step only): embedding LayerNorm into the resident
    # output block, which then carries the activation across the layer axis.
    @pl.when(layer == 0)
    def _():
        out_ref[0] = _layernorm(x_ref[0], embg_ref[...], embb_ref[...])

    x = out_ref[0]                       # (S, H) f32, resident across layers
    mask = mask_ref[0]                   # (1, S) additive bias
    S, H = x.shape
    dh = H // num_heads
    scale = 1.0 / (dh ** 0.5)

    # ---- fused QKV projection (bf16 operands, f32 accumulation) ----
    xb = x.astype(jnp.bfloat16)
    qkv = jnp.dot(xb, wqkv_ref[0], preferred_element_type=jnp.float32)
    qkv = qkv + bqkv_ref[0]              # (S, 3H) f32
    q, k, v = qkv[:, :H], qkv[:, H:2 * H], qkv[:, 2 * H:]

    # ---- batched multi-head attention ----
    def head_stack(t):                   # (S, H) -> (NH, S, dh)
        return jnp.stack(
            [t[:, h * dh:(h + 1) * dh] for h in range(num_heads)], axis=0)

    q3 = head_stack(q).astype(jnp.bfloat16)
    k3 = head_stack(k).astype(jnp.bfloat16)
    v3 = head_stack(v).astype(jnp.bfloat16)

    # scores: contract last dims of both operands (no explicit .T)
    scores = jnp.einsum('hqd,hkd->hqk', q3, k3,
                        preferred_element_type=jnp.float32)
    scores = scores * scale + mask       # (NH, S, S) + (1, S)

    # softmax in f32; reciprocal on EUP
    m = jnp.max(scores, axis=-1, keepdims=True)
    p = jnp.exp(scores - m)
    p = p * pl.reciprocal(jnp.sum(p, axis=-1, keepdims=True), approx=True)

    ctx = jnp.einsum('hqk,hkd->hqd', p.astype(jnp.bfloat16), v3,
                     preferred_element_type=jnp.float32)       # (NH, S, dh)
    ctx_flat = jnp.concatenate([ctx[h] for h in range(num_heads)], axis=-1)

    # single full-width output projection
    attn = jnp.dot(ctx_flat.astype(jnp.bfloat16), wo_ref[0],
                   preferred_element_type=jnp.float32) + bo_ref[0]

    h1 = _layernorm(x + attn, g1_ref[0], be1_ref[0])

    # ---- FFN ----
    ff = jnp.dot(h1.astype(jnp.bfloat16), w1_ref[0],
                 preferred_element_type=jnp.float32) + fb1_ref[0]
    # TODO(synk): HF BERT uses exact erf-GELU; tanh approximation used here.
    ff = jax.nn.gelu(ff, approximate=True)
    ff = jnp.dot(ff.astype(jnp.bfloat16), w2_ref[0],
                 preferred_element_type=jnp.float32) + fb2_ref[0]

    out_ref[0] = _layernorm(h1 + ff, g2_ref[0], be2_ref[0])


# ----------------------------- wrapper ---------------------------------------


def encoder_forward(x, mask_bias, params, num_heads):
    B, S, H = x.shape
    L = params["wqkv"].shape[0]
    FF = params["w1"].shape[-1]

    def batch_spec(shape):   # per-batch-element activation blocks
        return pl.BlockSpec(shape, lambda b, l: (b,) + (0,) * (len(shape) - 1))

    def layer_spec(shape):   # per-layer streamed weight blocks
        return pl.BlockSpec(shape, lambda b, l: (l,) + (0,) * (len(shape) - 1))

    def const_spec(shape):   # constant (embedding LN) params
        return pl.BlockSpec(shape, lambda b, l: (0,) * len(shape))

    in_specs = [
        batch_spec((1, S, H)),                       # x (post-embedding)
        batch_spec((1, 1, S)),                       # additive mask bias
        const_spec((1, H)), const_spec((1, H)),      # emb LN gamma / beta
        layer_spec((1, H, 3 * H)), layer_spec((1, 1, 3 * H)),   # wqkv, bqkv
        layer_spec((1, H, H)),     layer_spec((1, 1, H)),       # wo, bo
        layer_spec((1, 1, H)),     layer_spec((1, 1, H)),       # ln1 g / b
        layer_spec((1, H, FF)),    layer_spec((1, 1, FF)),      # w1, b1
        layer_spec((1, FF, H)),    layer_spec((1, 1, H)),       # w2, b2
        layer_spec((1, 1, H)),     layer_spec((1, 1, H)),       # ln2 g / b
    ]

    return pl.pallas_call(
        functools.partial(fused_encoder_kernel, num_heads),
        out_shape=jax.ShapeDtypeStruct((B, S, H), jnp.float32),
        grid=(B, L),
        in_specs=in_specs,
        out_specs=pl.BlockSpec((1, S, H), lambda b, l: (b, 0, 0)),
        compiler_params=pltpu.CompilerParams(
            dimension_semantics=("parallel", "arbitrary"),
            vmem_limit_bytes=32 * 1024 * 1024,
        ),
    )(x, mask_bias, params["emb_ln_g"], params["emb_ln_b"],
      params["wqkv"], params["bqkv"], params["wo"], params["bo"],
      params["ln1_g"], params["ln1_b"], params["w1"], params["fb1"],
      params["w2"], params["fb2"], params["ln2_g"], params["ln2_b"])


def sentence_encoder(input_ids, attention_mask, params, num_heads):
    """Equivalent of SentenceEncoder.forward: returns last_hidden_state[:, 0]."""
    B, S = input_ids.shape
    # --- embeddings (gather glue in plain JAX) ---
    x = jnp.take(params["word_emb"], input_ids, axis=0)           # (B, S, H)
    x = x + params["pos_emb"][:S][None, :, :]
    x = x + params["tok_emb"][0][None, None, :]
    x = x.astype(jnp.float32)

    # additive attention-mask bias (B, 1, S)
    mask_bias = ((1.0 - attention_mask.astype(jnp.float32)) * -1e9).reshape(B, 1, S)

    hidden = encoder_forward(x, mask_bias, params, num_heads)     # (B, S, H)
    return hidden[:, 0]                                           # (B, H)


# ----------------------------- params ----------------------------------------


def init_params(key, vocab, max_pos, H, FF, num_layers):
    def normal(k, shape):
        return (0.02 * jax.random.normal(k, shape)).astype(jnp.float32)

    k_emb, k_layers = jax.random.split(key)
    kw, kp, kt = jax.random.split(k_emb, 3)
    lkeys = jax.random.split(k_layers, num_layers)

    wqkv, wo, w1, w2 = [], [], [], []
    for lk in lkeys:
        k0, k1, k2, k3 = jax.random.split(lk, 4)
        wqkv.append(normal(k0, (H, 3 * H)))
        wo.append(normal(k1, (H, H)))
        w1.append(normal(k2, (H, FF)))
        w2.append(normal(k3, (FF, H)))

    L = num_layers
    return {
        "word_emb": normal(kw, (vocab, H)),
        "pos_emb": normal(kp, (max_pos, H)),
        "tok_emb": normal(kt, (2, H)),
        "emb_ln_g": jnp.ones((1, H), jnp.float32),
        "emb_ln_b": jnp.zeros((1, H), jnp.float32),
        # matmul weights stored/streamed in bf16 (half DMA bytes, half VMEM)
        "wqkv": jnp.stack(wqkv).astype(jnp.bfloat16),
        "wo":   jnp.stack(wo).astype(jnp.bfloat16),
        "w1":   jnp.stack(w1).astype(jnp.bfloat16),
        "w2":   jnp.stack(w2).astype(jnp.bfloat16),
        # biases / LayerNorm params stay f32
        "bqkv": jnp.zeros((L, 1, 3 * H), jnp.float32),
        "bo":   jnp.zeros((L, 1, H), jnp.float32),
        "ln1_g": jnp.ones((L, 1, H), jnp.float32),
        "ln1_b": jnp.zeros((L, 1, H), jnp.float32),
        "fb1":  jnp.zeros((L, 1, FF), jnp.float32),
        "fb2":  jnp.zeros((L, 1, H), jnp.float32),
        "ln2_g": jnp.ones((L, 1, H), jnp.float32),
        "ln2_b": jnp.zeros((L, 1, H), jnp.float32),
    }


# ----------------------------- main -------------------------------------------


if __name__ == "__main__":
    # small but lane-dense shapes: H, FF multiples of 128; S multiple of 8
    B, S, H, NH, FF, L = 2, 8, 128, 4, 256, 2
    VOCAB, MAX_POS = 100, 16

    key = jax.random.PRNGKey(0)
    k_param, k_ids = jax.random.split(key)

    params = init_params(k_param, VOCAB, MAX_POS, H, FF, L)

    input_ids = jax.random.randint(k_ids, (B, S), 0, VOCAB, dtype=jnp.int32)
    attention_mask = jnp.array([[1, 1, 1, 1, 1, 1, 1, 1],
                                [1, 1, 1, 1, 1, 1, 0, 0]], dtype=jnp.int32)

    emb = sentence_encoder(input_ids, attention_mask, params, NH)
    emb = jax.block_until_ready(emb)

    assert emb.shape == (B, H) and emb.dtype == jnp.float32
    assert bool(jnp.all(jnp.isfinite(emb)))
    print("KERNEL_OK")
</pallas_src>

<mosaic_0001>
module attributes {stable_mosaic.version = 11 : i64} {
  func.func @fused_encoder_kernel(%arg0: i32, %arg1: i32, %arg2: memref<1x8x128xf32, #tpu.memory_space<vmem>>, %arg3: memref<1x1x8xf32, #tpu.memory_space<vmem>>, %arg4: memref<1x128xf32, #tpu.memory_space<vmem>>, %arg5: memref<1x128xf32, #tpu.memory_space<vmem>>, %arg6: memref<1x128x384xbf16, #tpu.memory_space<vmem>>, %arg7: memref<1x1x384xf32, #tpu.memory_space<vmem>>, %arg8: memref<1x128x128xbf16, #tpu.memory_space<vmem>>, %arg9: memref<1x1x128xf32, #tpu.memory_space<vmem>>, %arg10: memref<1x1x128xf32, #tpu.memory_space<vmem>>, %arg11: memref<1x1x128xf32, #tpu.memory_space<vmem>>, %arg12: memref<1x128x256xbf16, #tpu.memory_space<vmem>>, %arg13: memref<1x1x256xf32, #tpu.memory_space<vmem>>, %arg14: memref<1x256x128xbf16, #tpu.memory_space<vmem>>, %arg15: memref<1x1x128xf32, #tpu.memory_space<vmem>>, %arg16: memref<1x1x128xf32, #tpu.memory_space<vmem>>, %arg17: memref<1x1x128xf32, #tpu.memory_space<vmem>>, %arg18: memref<1x8x128xf32, #tpu.memory_space<vmem>>) attributes {dimension_semantics = [#tpu.dimension_semantics<parallel>, #tpu.dimension_semantics<arbitrary>], iteration_bounds = array<i64: 2, 2>, scalar_prefetch = 0 : i64, scratch_operands = 0 : i64, tpu.core_type = #tpu.core_type<tc>, window_params = [{transform_indices = @transform_0, window_bounds = array<i64: 1, 8, 128>}, {transform_indices = @transform_1, window_bounds = array<i64: 1, 1, 8>}, {pipeline_mode = #tpu.pipeline_mode<synchronous>, transform_indices = @transform_2, window_bounds = array<i64: 1, 128>}, {pipeline_mode = #tpu.pipeline_mode<synchronous>, transform_indices = @transform_3, window_bounds = array<i64: 1, 128>}, {transform_indices = @transform_4, window_bounds = array<i64: 1, 128, 384>}, {transform_indices = @transform_5, window_bounds = array<i64: 1, 1, 384>}, {transform_indices = @transform_6, window_bounds = array<i64: 1, 128, 128>}, {transform_indices = @transform_7, window_bounds = array<i64: 1, 1, 128>}, {transform_indices = @transform_8, window_bounds = array<i64: 1, 1, 128>}, {transform_indices = @transform_9, window_bounds = array<i64: 1, 1, 128>}, {transform_indices = @transform_10, window_bounds = array<i64: 1, 128, 256>}, {transform_indices = @transform_11, window_bounds = array<i64: 1, 1, 256>}, {transform_indices = @transform_12, window_bounds = array<i64: 1, 256, 128>}, {transform_indices = @transform_13, window_bounds = array<i64: 1, 1, 128>}, {transform_indices = @transform_14, window_bounds = array<i64: 1, 1, 128>}, {transform_indices = @transform_15, window_bounds = array<i64: 1, 1, 128>}, {transform_indices = @transform_16, window_bounds = array<i64: 1, 8, 128>}]} {
    %c0_i32 = arith.constant 0 : i32
    %0 = arith.cmpi eq, %arg1, %c0_i32 : i32
    %1 = arith.extui %0 : i1 to i32
    %c0_i32_0 = arith.constant 0 : i32
    %2 = arith.cmpi ne, %1, %c0_i32_0 : i32
    scf.if %2 {
      %c0_67 = arith.constant 0 : index
      %c0_68 = arith.constant 0 : index
      %c0_69 = arith.constant 0 : index
      %169 = vector.load %arg2[%c0_67, %c0_68, %c0_69] : memref<1x8x128xf32, #tpu.memory_space<vmem>>, vector<1x8x128xf32>
      %170 = vector.shape_cast %169 : vector<1x8x128xf32> to vector<8x128xf32>
      %c0_70 = arith.constant 0 : index
      %c0_71 = arith.constant 0 : index
      %171 = vector.load %arg4[%c0_70, %c0_71] : memref<1x128xf32, #tpu.memory_space<vmem>>, vector<1x128xf32>
      %c0_72 = arith.constant 0 : index
      %c0_73 = arith.constant 0 : index
      %172 = vector.load %arg5[%c0_72, %c0_73] : memref<1x128xf32, #tpu.memory_space<vmem>>, vector<1x128xf32>
      %cst_74 = arith.constant dense<0.000000e+00> : vector<8xf32>
      %173 = vector.multi_reduction <add>, %170, %cst_74 [1] : vector<8x128xf32> to vector<8xf32>
      %174 = vector.shape_cast %173 : vector<8xf32> to vector<8x1xf32>
      %cst_75 = arith.constant 1.280000e+02 : f32
      %175 = vector.broadcast %cst_75 : f32 to vector<8x1xf32>
      %176 = arith.divf %174, %175 : vector<8x1xf32>
      %177 = vector.broadcast %176 : vector<8x1xf32> to vector<8x128xf32>
      %178 = arith.subf %170, %177 : vector<8x128xf32>
      %179 = arith.mulf %178, %178 : vector<8x128xf32>
      %cst_76 = arith.constant dense<0.000000e+00> : vector<8xf32>
      %180 = vector.multi_reduction <add>, %179, %cst_76 [1] : vector<8x128xf32> to vector<8xf32>
      %181 = vector.shape_cast %180 : vector<8xf32> to vector<8x1xf32>
      %cst_77 = arith.constant 1.280000e+02 : f32
      %182 = vector.broadcast %cst_77 : f32 to vector<8x1xf32>
      %183 = arith.divf %181, %182 : vector<8x1xf32>
      %cst_78 = arith.constant 9.99999996E-13 : f32
      %184 = vector.broadcast %cst_78 : f32 to vector<8x1xf32>
      %185 = arith.addf %183, %184 : vector<8x1xf32>
      %186 = math.rsqrt %185 : vector<8x1xf32>
      %187 = vector.broadcast %176 : vector<8x1xf32> to vector<8x128xf32>
      %188 = arith.subf %170, %187 : vector<8x128xf32>
      %189 = vector.broadcast %186 : vector<8x1xf32> to vector<8x128xf32>
      %190 = arith.mulf %188, %189 : vector<8x128xf32>
      %191 = vector.broadcast %171 : vector<1x128xf32> to vector<8x128xf32>
      %192 = arith.mulf %190, %191 : vector<8x128xf32>
      %193 = vector.broadcast %172 : vector<1x128xf32> to vector<8x128xf32>
      %194 = arith.addf %192, %193 : vector<8x128xf32>
      %c0_79 = arith.constant 0 : index
      %c0_80 = arith.constant 0 : index
      %c0_81 = arith.constant 0 : index
      %195 = vector.load %arg18[%c0_79, %c0_80, %c0_81] : memref<1x8x128xf32, #tpu.memory_space<vmem>>, vector<1x8x128xf32>
      %196 = vector.shape_cast %195 : vector<1x8x128xf32> to vector<8x128xf32>
      %197 = vector.shape_cast %194 : vector<8x128xf32> to vector<1x8x128xf32>
      tpu.vector_store %arg18[%c0_79, %c0_80, %c0_81], %197 {strides = array<i32>} : memref<1x8x128xf32, #tpu.memory_space<vmem>>, vector<1x8x128xf32>,
    } else {
    }
    %c0 = arith.constant 0 : index
    %c0_1 = arith.constant 0 : index
    %c0_2 = arith.constant 0 : index
    %3 = vector.load %arg18[%c0, %c0_1, %c0_2] : memref<1x8x128xf32, #tpu.memory_space<vmem>>, vector<1x8x128xf32>
    %4 = vector.shape_cast %3 : vector<1x8x128xf32> to vector<8x128xf32>
    %c0_3 = arith.constant 0 : index
    %c0_4 = arith.constant 0 : index
    %c0_5 = arith.constant 0 : index
    %5 = vector.load %arg3[%c0_3, %c0_4, %c0_5] : memref<1x1x8xf32, #tpu.memory_space<vmem>>, vector<1x1x8xf32>
    %6 = vector.shape_cast %5 : vector<1x1x8xf32> to vector<1x8xf32>
    %7 = arith.truncf %4 : vector<8x128xf32> to vector<8x128xbf16>
    %c0_6 = arith.constant 0 : index
    %c0_7 = arith.constant 0 : index
    %c0_8 = arith.constant 0 : index
    %8 = vector.load %arg6[%c0_6, %c0_7, %c0_8] : memref<1x128x384xbf16, #tpu.memory_space<vmem>>, vector<1x128x384xbf16>
    %9 = vector.shape_cast %8 : vector<1x128x384xbf16> to vector<128x384xbf16>
    %cst = arith.constant dense<0.000000e+00> : vector<8x384xf32>
    %10 = tpu.matmul %7, %9, %cst {dimension_numbers = #tpu.dot_dimension_numbers<[1], [0], [0], [1], [0, 0, 1, 1], [], []>} : vector<8x128xbf16>, vector<128x384xbf16>, vector<8x384xf32> -> vector<8x384xf32>
    %c0_9 = arith.constant 0 : index
    %c0_10 = arith.constant 0 : index
    %c0_11 = arith.constant 0 : index
    %11 = vector.load %arg7[%c0_9, %c0_10, %c0_11] : memref<1x1x384xf32, #tpu.memory_space<vmem>>, vector<1x1x384xf32>
    %12 = vector.shape_cast %11 : vector<1x1x384xf32> to vector<1x384xf32>
    %13 = vector.broadcast %12 : vector<1x384xf32> to vector<8x384xf32>
    %14 = arith.addf %10, %13 : vector<8x384xf32>
    %15 = vector.extract_strided_slice %14 {offsets = [0, 0], sizes = [8, 128], strides = [1, 1]} : vector<8x384xf32> to vector<8x128xf32>
    %16 = vector.extract_strided_slice %14 {offsets = [0, 128], sizes = [8, 128], strides = [1, 1]} : vector<8x384xf32> to vector<8x128xf32>
    %17 = vector.extract_strided_slice %14 {offsets = [0, 256], sizes = [8, 128], strides = [1, 1]} : vector<8x384xf32> to vector<8x128xf32>
    %18 = vector.extract_strided_slice %15 {offsets = [0, 0], sizes = [8, 32], strides = [1, 1]} : vector<8x128xf32> to vector<8x32xf32>
    %19 = vector.extract_strided_slice %15 {offsets = [0, 32], sizes = [8, 32], strides = [1, 1]} : vector<8x128xf32> to vector<8x32xf32>
    %20 = vector.extract_strided_slice %15 {offsets = [0, 64], sizes = [8, 32], strides = [1, 1]} : vector<8x128xf32> to vector<8x32xf32>
    %21 = vector.extract_strided_slice %15 {offsets = [0, 96], sizes = [8, 32], strides = [1, 1]} : vector<8x128xf32> to vector<8x32xf32>
    %22 = vector.shape_cast %18 : vector<8x32xf32> to vector<1x8x32xf32>
    %23 = vector.shape_cast %19 : vector<8x32xf32> to vector<1x8x32xf32>
    %24 = vector.shape_cast %20 : vector<8x32xf32> to vector<1x8x32xf32>
    %25 = vector.shape_cast %21 : vector<8x32xf32> to vector<1x8x32xf32>
    %26 = tpu.concatenate %22, %23, %24, %25 in 0 : vector<1x8x32xf32>, vector<1x8x32xf32>, vector<1x8x32xf32>, vector<1x8x32xf32> -> vector<4x8x32xf32>
    %27 = arith.truncf %26 : vector<4x8x32xf32> to vector<4x8x32xbf16>
    %28 = vector.extract_strided_slice %16 {offsets = [0, 0], sizes = [8, 32], strides = [1, 1]} : vector<8x128xf32> to vector<8x32xf32>
    %29 = vector.extract_strided_slice %16 {offsets = [0, 32], sizes = [8, 32], strides = [1, 1]} : vector<8x128xf32> to vector<8x32xf32>
    %30 = vector.extract_strided_slice %16 {offsets = [0, 64], sizes = [8, 32], strides = [1, 1]} : vector<8x128xf32> to vector<8x32xf32>
    %31 = vector.extract_strided_slice %16 {offsets = [0, 96], sizes = [8, 32], strides = [1, 1]} : vector<8x128xf32> to vector<8x32xf32>
    %32 = vector.shape_cast %28 : vector<8x32xf32> to vector<1x8x32xf32>
    %33 = vector.shape_cast %29 : vector<8x32xf32> to vector<1x8x32xf32>
    %34 = vector.shape_cast %30 : vector<8x32xf32> to vector<1x8x32xf32>
    %35 = vector.shape_cast %31 : vector<8x32xf32> to vector<1x8x32xf32>
    %36 = tpu.concatenate %32, %33, %34, %35 in 0 : vector<1x8x32xf32>, vector<1x8x32xf32>, vector<1x8x32xf32>, vector<1x8x32xf32> -> vector<4x8x32xf32>
    %37 = arith.truncf %36 : vector<4x8x32xf32> to vector<4x8x32xbf16>
    %38 = vector.extract_strided_slice %17 {offsets = [0, 0], sizes = [8, 32], strides = [1, 1]} : vector<8x128xf32> to vector<8x32xf32>
    %39 = vector.extract_strided_slice %17 {offsets = [0, 32], sizes = [8, 32], strides = [1, 1]} : vector<8x128xf32> to vector<8x32xf32>
    %40 = vector.extract_strided_slice %17 {offsets = [0, 64], sizes = [8, 32], strides = [1, 1]} : vector<8x128xf32> to vector<8x32xf32>
    %41 = vector.extract_strided_slice %17 {offsets = [0, 96], sizes = [8, 32], strides = [1, 1]} : vector<8x128xf32> to vector<8x32xf32>
    %42 = vector.shape_cast %38 : vector<8x32xf32> to vector<1x8x32xf32>
    %43 = vector.shape_cast %39 : vector<8x32xf32> to vector<1x8x32xf32>
    %44 = vector.shape_cast %40 : vector<8x32xf32> to vector<1x8x32xf32>
    %45 = vector.shape_cast %41 : vector<8x32xf32> to vector<1x8x32xf32>
    %46 = tpu.concatenate %42, %43, %44, %45 in 0 : vector<1x8x32xf32>, vector<1x8x32xf32>, vector<1x8x32xf32>, vector<1x8x32xf32> -> vector<4x8x32xf32>
    %47 = arith.truncf %46 : vector<4x8x32xf32> to vector<4x8x32xbf16>
    "tpu.trace_start"() <{level = 10 : i32, message = "hqd,hkd->hqk"}> : () -> ()
    %cst_12 = arith.constant dense<0.000000e+00> : vector<4x8x8xf32>
    %48 = tpu.matmul %27, %37, %cst_12 {dimension_numbers = #tpu.dot_dimension_numbers<[2], [2], [1], [1], [0, 0, 0, 1, 1, 1], [0], [0]>} : vector<4x8x32xbf16>, vector<4x8x32xbf16>, vector<4x8x8xf32> -> vector<4x8x8xf32>
    "tpu.trace_stop"() : () -> ()
    %cst_13 = arith.constant 0.176776692 : f32
    %49 = vector.broadcast %cst_13 : f32 to vector<4x8x8xf32>
    %50 = arith.mulf %48, %49 : vector<4x8x8xf32>
    %51 = vector.shape_cast %6 : vector<1x8xf32> to vector<1x1x8xf32>
    %52 = vector.broadcast %51 : vector<1x1x8xf32> to vector<4x8x8xf32>
    %53 = arith.addf %50, %52 : vector<4x8x8xf32>
    %cst_14 = arith.constant dense<0xFF800000> : vector<4x8xf32>
    %54 = vector.multi_reduction <maximumf>, %53, %cst_14 [2] : vector<4x8x8xf32> to vector<4x8xf32>
    %55 = vector.shape_cast %54 : vector<4x8xf32> to vector<4x8x1xf32>
    %56 = vector.broadcast %55 : vector<4x8x1xf32> to vector<4x8x8xf32>
    %57 = arith.subf %53, %56 : vector<4x8x8xf32>
    %58 = math.exp %57 : vector<4x8x8xf32>
    %cst_15 = arith.constant dense<0.000000e+00> : vector<4x8xf32>
    %59 = vector.multi_reduction <add>, %58, %cst_15 [2] : vector<4x8x8xf32> to vector<4x8xf32>
    %60 = vector.shape_cast %59 : vector<4x8xf32> to vector<4x8x1xf32>
    %61 = tpu.reciprocal %60 {approx = true} : vector<4x8x1xf32> -> vector<4x8x1xf32>
    %62 = vector.broadcast %61 : vector<4x8x1xf32> to vector<4x8x8xf32>
    %63 = arith.mulf %58, %62 : vector<4x8x8xf32>
    %64 = arith.truncf %63 : vector<4x8x8xf32> to vector<4x8x8xbf16>
    "tpu.trace_start"() <{level = 10 : i32, message = "hqk,hkd->hqd"}> : () -> ()
    %cst_16 = arith.constant dense<0.000000e+00> : vector<4x8x32xf32>
    %65 = tpu.matmul %64, %47, %cst_16 {dimension_numbers = #tpu.dot_dimension_numbers<[2], [1], [1], [2], [0, 0, 0, 1, 1, 2], [0], [0]>} : vector<4x8x8xbf16>, vector<4x8x32xbf16>, vector<4x8x32xf32> -> vector<4x8x32xf32>
    "tpu.trace_stop"() : () -> ()
    %66 = vector.extract_strided_slice %65 {offsets = [0, 0, 0], sizes = [1, 8, 32], strides = [1, 1, 1]} : vector<4x8x32xf32> to vector<1x8x32xf32>
    %67 = vector.shape_cast %66 : vector<1x8x32xf32> to vector<8x32xf32>
    %68 = vector.extract_strided_slice %65 {offsets = [1, 0, 0], sizes = [1, 8, 32], strides = [1, 1, 1]} : vector<4x8x32xf32> to vector<1x8x32xf32>
    %69 = vector.shape_cast %68 : vector<1x8x32xf32> to vector<8x32xf32>
    %70 = vector.extract_strided_slice %65 {offsets = [2, 0, 0], sizes = [1, 8, 32], strides = [1, 1, 1]} : vector<4x8x32xf32> to vector<1x8x32xf32>
    %71 = vector.shape_cast %70 : vector<1x8x32xf32> to vector<8x32xf32>
    %72 = vector.extract_strided_slice %65 {offsets = [3, 0, 0], sizes = [1, 8, 32], strides = [1, 1, 1]} : vector<4x8x32xf32> to vector<1x8x32xf32>
    %73 = vector.shape_cast %72 : vector<1x8x32xf32> to vector<8x32xf32>
    %74 = tpu.concatenate %67, %69, %71, %73 in 1 : vector<8x32xf32>, vector<8x32xf32>, vector<8x32xf32>, vector<8x32xf32> -> vector<8x128xf32>
    %75 = arith.truncf %74 : vector<8x128xf32> to vector<8x128xbf16>
    %c0_17 = arith.constant 0 : index
    %c0_18 = arith.constant 0 : index
    %c0_19 = arith.constant 0 : index
    %76 = vector.load %arg8[%c0_17, %c0_18, %c0_19] : memref<1x128x128xbf16, #tpu.memory_space<vmem>>, vector<1x128x128xbf16>
    %77 = vector.shape_cast %76 : vector<1x128x128xbf16> to vector<128x128xbf16>
    %cst_20 = arith.constant dense<0.000000e+00> : vector<8x128xf32>
    %78 = tpu.matmul %75, %77, %cst_20 {dimension_numbers = #tpu.dot_dimension_numbers<[1], [0], [0], [1], [0, 0, 1, 1], [], []>} : vector<8x128xbf16>, vector<128x128xbf16>, vector<8x128xf32> -> vector<8x128xf32>
    %c0_21 = arith.constant 0 : index
    %c0_22 = arith.constant 0 : index
    %c0_23 = arith.constant 0 : index
    %79 = vector.load %arg9[%c0_21, %c0_22, %c0_23] : memref<1x1x128xf32, #tpu.memory_space<vmem>>, vector<1x1x128xf32>
    %80 = vector.shape_cast %79 : vector<1x1x128xf32> to vector<1x128xf32>
    %81 = vector.broadcast %80 : vector<1x128xf32> to vector<8x128xf32>
    %82 = arith.addf %78, %81 : vector<8x128xf32>
    %83 = arith.addf %4, %82 : vector<8x128xf32>
    %c0_24 = arith.constant 0 : index
    %c0_25 = arith.constant 0 : index
    %c0_26 = arith.constant 0 : index
    %84 = vector.load %arg10[%c0_24, %c0_25, %c0_26] : memref<1x1x128xf32, #tpu.memory_space<vmem>>, vector<1x1x128xf32>
    %85 = vector.shape_cast %84 : vector<1x1x128xf32> to vector<1x128xf32>
    %c0_27 = arith.constant 0 : index
    %c0_28 = arith.constant 0 : index
    %c0_29 = arith.constant 0 : index
    %86 = vector.load %arg11[%c0_27, %c0_28, %c0_29] : memref<1x1x128xf32, #tpu.memory_space<vmem>>, vector<1x1x128xf32>
    %87 = vector.shape_cast %86 : vector<1x1x128xf32> to vector<1x128xf32>
    %cst_30 = arith.constant dense<0.000000e+00> : vector<8xf32>
    %88 = vector.multi_reduction <add>, %83, %cst_30 [1] : vector<8x128xf32> to vector<8xf32>
    %89 = vector.shape_cast %88 : vector<8xf32> to vector<8x1xf32>
    %cst_31 = arith.constant 1.280000e+02 : f32
    %90 = vector.broadcast %cst_31 : f32 to vector<8x1xf32>
    %91 = arith.divf %89, %90 : vector<8x1xf32>
    %92 = vector.broadcast %91 : vector<8x1xf32> to vector<8x128xf32>
    %93 = arith.subf %83, %92 : vector<8x128xf32>
    %94 = arith.mulf %93, %93 : vector<8x128xf32>
    %cst_32 = arith.constant dense<0.000000e+00> : vector<8xf32>
    %95 = vector.multi_reduction <add>, %94, %cst_32 [1] : vector<8x128xf32> to vector<8xf32>
    %96 = vector.shape_cast %95 : vector<8xf32> to vector<8x1xf32>
    %cst_33 = arith.constant 1.280000e+02 : f32
    %97 = vector.broadcast %cst_33 : f32 to vector<8x1xf32>
    %98 = arith.divf %96, %97 : vector<8x1xf32>
    %cst_34 = arith.constant 9.99999996E-13 : f32
    %99 = vector.broadcast %cst_34 : f32 to vector<8x1xf32>
    %100 = arith.addf %98, %99 : vector<8x1xf32>
    %101 = math.rsqrt %100 : vector<8x1xf32>
    %102 = vector.broadcast %91 : vector<8x1xf32> to vector<8x128xf32>
    %103 = arith.subf %83, %102 : vector<8x128xf32>
    %104 = vector.broadcast %101 : vector<8x1xf32> to vector<8x128xf32>
    %105 = arith.mulf %103, %104 : vector<8x128xf32>
    %106 = vector.broadcast %85 : vector<1x128xf32> to vector<8x128xf32>
    %107 = arith.mulf %105, %106 : vector<8x128xf32>
    %108 = vector.broadcast %87 : vector<1x128xf32> to vector<8x128xf32>
    %109 = arith.addf %107, %108 : vector<8x128xf32>
    %110 = arith.truncf %109 : vector<8x128xf32> to vector<8x128xbf16>
    %c0_35 = arith.constant 0 : index
    %c0_36 = arith.constant 0 : index
    %c0_37 = arith.constant 0 : index
    %111 = vector.load %arg12[%c0_35, %c0_36, %c0_37] : memref<1x128x256xbf16, #tpu.memory_space<vmem>>, vector<1x128x256xbf16>
    %112 = vector.shape_cast %111 : vector<1x128x256xbf16> to vector<128x256xbf16>
    %cst_38 = arith.constant dense<0.000000e+00> : vector<8x256xf32>
    %113 = tpu.matmul %110, %112, %cst_38 {dimension_numbers = #tpu.dot_dimension_numbers<[1], [0], [0], [1], [0, 0, 1, 1], [], []>} : vector<8x128xbf16>, vector<128x256xbf16>, vector<8x256xf32> -> vector<8x256xf32>
    %c0_39 = arith.constant 0 : index
    %c0_40 = arith.constant 0 : index
    %c0_41 = arith.constant 0 : index
    %114 = vector.load %arg13[%c0_39, %c0_40, %c0_41] : memref<1x1x256xf32, #tpu.memory_space<vmem>>, vector<1x1x256xf32>
    %115 = vector.shape_cast %114 : vector<1x1x256xf32> to vector<1x256xf32>
    %116 = vector.broadcast %115 : vector<1x256xf32> to vector<8x256xf32>
    %117 = arith.addf %113, %116 : vector<8x256xf32>
    %118 = arith.mulf %117, %117 : vector<8x256xf32>
    %119 = arith.mulf %117, %118 : vector<8x256xf32>
    %cst_42 = arith.constant 4.471500e-02 : f32
    %120 = vector.broadcast %cst_42 : f32 to vector<8x256xf32>
    %121 = arith.mulf %120, %119 : vector<8x256xf32>
    %122 = arith.addf %117, %121 : vector<8x256xf32>
    %cst_43 = arith.constant 0.797884583 : f32
    %123 = vector.broadcast %cst_43 : f32 to vector<8x256xf32>
    %124 = arith.mulf %123, %122 : vector<8x256xf32>
    %125 = math.tanh %124 : vector<8x256xf32>
    %cst_44 = arith.constant 1.000000e+00 : f32
    %126 = vector.broadcast %cst_44 : f32 to vector<8x256xf32>
    %127 = arith.addf %126, %125 : vector<8x256xf32>
    %cst_45 = arith.constant 5.000000e-01 : f32
    %128 = vector.broadcast %cst_45 : f32 to vector<8x256xf32>
    %129 = arith.mulf %128, %127 : vector<8x256xf32>
    %130 = arith.mulf %117, %129 : vector<8x256xf32>
    %131 = arith.truncf %130 : vector<8x256xf32> to vector<8x256xbf16>
    %c0_46 = arith.constant 0 : index
    %c0_47 = arith.constant 0 : index
    %c0_48 = arith.constant 0 : index
    %132 = vector.load %arg14[%c0_46, %c0_47, %c0_48] : memref<1x256x128xbf16, #tpu.memory_space<vmem>>, vector<1x256x128xbf16>
    %133 = vector.shape_cast %132 : vector<1x256x128xbf16> to vector<256x128xbf16>
    %cst_49 = arith.constant dense<0.000000e+00> : vector<8x128xf32>
    %134 = tpu.matmul %131, %133, %cst_49 {dimension_numbers = #tpu.dot_dimension_numbers<[1], [0], [0], [1], [0, 0, 1, 1], [], []>} : vector<8x256xbf16>, vector<256x128xbf16>, vector<8x128xf32> -> vector<8x128xf32>
    %c0_50 = arith.constant 0 : index
    %c0_51 = arith.constant 0 : index
    %c0_52 = arith.constant 0 : index
    %135 = vector.load %arg15[%c0_50, %c0_51, %c0_52] : memref<1x1x128xf32, #tpu.memory_space<vmem>>, vector<1x1x128xf32>
    %136 = vector.shape_cast %135 : vector<1x1x128xf32> to vector<1x128xf32>
    %137 = vector.broadcast %136 : vector<1x128xf32> to vector<8x128xf32>
    %138 = arith.addf %134, %137 : vector<8x128xf32>
    %139 = arith.addf %109, %138 : vector<8x128xf32>
    %c0_53 = arith.constant 0 : index
    %c0_54 = arith.constant 0 : index
    %c0_55 = arith.constant 0 : index
    %140 = vector.load %arg16[%c0_53, %c0_54, %c0_55] : memref<1x1x128xf32, #tpu.memory_space<vmem>>, vector<1x1x128xf32>
    %141 = vector.shape_cast %140 : vector<1x1x128xf32> to vector<1x128xf32>
    %c0_56 = arith.constant 0 : index
    %c0_57 = arith.constant 0 : index
    %c0_58 = arith.constant 0 : index
    %142 = vector.load %arg17[%c0_56, %c0_57, %c0_58] : memref<1x1x128xf32, #tpu.memory_space<vmem>>, vector<1x1x128xf32>
    %143 = vector.shape_cast %142 : vector<1x1x128xf32> to vector<1x128xf32>
    %cst_59 = arith.constant dense<0.000000e+00> : vector<8xf32>
    %144 = vector.multi_reduction <add>, %139, %cst_59 [1] : vector<8x128xf32> to vector<8xf32>
    %145 = vector.shape_cast %144 : vector<8xf32> to vector<8x1xf32>
    %cst_60 = arith.constant 1.280000e+02 : f32
    %146 = vector.broadcast %cst_60 : f32 to vector<8x1xf32>
    %147 = arith.divf %145, %146 : vector<8x1xf32>
    %148 = vector.broadcast %147 : vector<8x1xf32> to vector<8x128xf32>
    %149 = arith.subf %139, %148 : vector<8x128xf32>
    %150 = arith.mulf %149, %149 : vector<8x128xf32>
    %cst_61 = arith.constant dense<0.000000e+00> : vector<8xf32>
    %151 = vector.multi_reduction <add>, %150, %cst_61 [1] : vector<8x128xf32> to vector<8xf32>
    %152 = vector.shape_cast %151 : vector<8xf32> to vector<8x1xf32>
    %cst_62 = arith.constant 1.280000e+02 : f32
    %153 = vector.broadcast %cst_62 : f32 to vector<8x1xf32>
    %154 = arith.divf %152, %153 : vector<8x1xf32>
    %cst_63 = arith.constant 9.99999996E-13 : f32
    %155 = vector.broadcast %cst_63 : f32 to vector<8x1xf32>
    %156 = arith.addf %154, %155 : vector<8x1xf32>
    %157 = math.rsqrt %156 : vector<8x1xf32>
    %158 = vector.broadcast %147 : vector<8x1xf32> to vector<8x128xf32>
    %159 = arith.subf %139, %158 : vector<8x128xf32>
    %160 = vector.broadcast %157 : vector<8x1xf32> to vector<8x128xf32>
    %161 = arith.mulf %159, %160 : vector<8x128xf32>
    %162 = vector.broadcast %141 : vector<1x128xf32> to vector<8x128xf32>
    %163 = arith.mulf %161, %162 : vector<8x128xf32>
    %164 = vector.broadcast %143 : vector<1x128xf32> to vector<8x128xf32>
    %165 = arith.addf %163, %164 : vector<8x128xf32>
    %c0_64 = arith.constant 0 : index
    %c0_65 = arith.constant 0 : index
    %c0_66 = arith.constant 0 : index
    %166 = vector.load %arg18[%c0_64, %c0_65, %c0_66] : memref<1x8x128xf32, #tpu.memory_space<vmem>>, vector<1x8x128xf32>
    %167 = vector.shape_cast %166 : vector<1x8x128xf32> to vector<8x128xf32>
    %168 = vector.shape_cast %165 : vector<8x128xf32> to vector<1x8x128xf32>
    tpu.vector_store %arg18[%c0_64, %c0_65, %c0_66], %168 {strides = array<i32>} : memref<1x8x128xf32, #tpu.memory_space<vmem>>, vector<1x8x128xf32>,
    return
  }
  func.func @transform_0(%arg0: i32, %arg1: i32) -> (i32, i32, i32) {
    %c0_i32 = arith.constant 0 : i32
    %c0_i32_0 = arith.constant 0 : i32
    %c0_i32_1 = arith.constant 0 : i32
    return %arg0, %c0_i32, %c0_i32_0 : i32, i32, i32
  }
  func.func @transform_1(%arg0: i32, %arg1: i32) -> (i32, i32, i32) {
    %c0_i32 = arith.constant 0 : i32
    %c0_i32_0 = arith.constant 0 : i32
    %c0_i32_1 = arith.constant 0 : i32
    return %arg0, %c0_i32, %c0_i32_0 : i32, i32, i32
  }
  func.func @transform_2(%arg0: i32, %arg1: i32) -> (i32, i32) {
    %c0_i32 = arith.constant 0 : i32
    %c0_i32_0 = arith.constant 0 : i32
    %c0_i32_1 = arith.constant 0 : i32
    return %c0_i32, %c0_i32_0 : i32, i32
  }
  func.func @transform_3(%arg0: i32, %arg1: i32) -> (i32, i32) {
    %c0_i32 = arith.constant 0 : i32
    %c0_i32_0 = arith.constant 0 : i32
    %c0_i32_1 = arith.constant 0 : i32
    return %c0_i32, %c0_i32_0 : i32, i32
  }
  func.func @transform_4(%arg0: i32, %arg1: i32) -> (i32, i32, i32) {
    %c0_i32 = arith.constant 0 : i32
    %c0_i32_0 = arith.constant 0 : i32
    %c0_i32_1 = arith.constant 0 : i32
    return %arg1, %c0_i32, %c0_i32_0 : i32, i32, i32
  }
  func.func @transform_5(%arg0: i32, %arg1: i32) -> (i32, i32, i32) {
    %c0_i32 = arith.constant 0 : i32
    %c0_i32_0 = arith.constant 0 : i32
    %c0_i32_1 = arith.constant 0 : i32
    return %arg1, %c0_i32, %c0_i32_0 : i32, i32, i32
  }
  func.func @transform_6(%arg0: i32, %arg1: i32) -> (i32, i32, i32) {
    %c0_i32 = arith.constant 0 : i32
    %c0_i32_0 = arith.constant 0 : i32
    %c0_i32_1 = arith.constant 0 : i32
    return %arg1, %c0_i32, %c0_i32_0 : i32, i32, i32
  }
  func.func @transform_7(%arg0: i32, %arg1: i32) -> (i32, i32, i32) {
    %c0_i32 = arith.constant 0 : i32
    %c0_i32_0 = arith.constant 0 : i32
    %c0_i32_1 = arith.constant 0 : i32
    return %arg1, %c0_i32, %c0_i32_0 : i32, i32, i32
  }
  func.func @transform_8(%arg0: i32, %arg1: i32) -> (i32, i32, i32) {
    %c0_i32 = arith.constant 0 : i32
    %c0_i32_0 = arith.constant 0 : i32
    %c0_i32_1 = arith.constant 0 : i32
    return %arg1, %c0_i32, %c0_i32_0 : i32, i32, i32
  }
  func.func @transform_9(%arg0: i32, %arg1: i32) -> (i32, i32, i32) {
    %c0_i32 = arith.constant 0 : i32
    %c0_i32_0 = arith.constant 0 : i32
    %c0_i32_1 = arith.constant 0 : i32
    return %arg1, %c0_i32, %c0_i32_0 : i32, i32, i32
  }
  func.func @transform_10(%arg0: i32, %arg1: i32) -> (i32, i32, i32) {
    %c0_i32 = arith.constant 0 : i32
    %c0_i32_0 = arith.constant 0 : i32
    %c0_i32_1 = arith.constant 0 : i32
    return %arg1, %c0_i32, %c0_i32_0 : i32, i32, i32
  }
  func.func @transform_11(%arg0: i32, %arg1: i32) -> (i32, i32, i32) {
    %c0_i32 = arith.constant 0 : i32
    %c0_i32_0 = arith.constant 0 : i32
    %c0_i32_1 = arith.constant 0 : i32
    return %arg1, %c0_i32, %c0_i32_0 : i32, i32, i32
  }
  func.func @transform_12(%arg0: i32, %arg1: i32) -> (i32, i32, i32) {
    %c0_i32 = arith.constant 0 : i32
    %c0_i32_0 = arith.constant 0 : i32
    %c0_i32_1 = arith.constant 0 : i32
    return %arg1, %c0_i32, %c0_i32_0 : i32, i32, i32
  }
  func.func @transform_13(%arg0: i32, %arg1: i32) -> (i32, i32, i32) {
    %c0_i32 = arith.constant 0 : i32
    %c0_i32_0 = arith.constant 0 : i32
    %c0_i32_1 = arith.constant 0 : i32
    return %arg1, %c0_i32, %c0_i32_0 : i32, i32, i32
  }
  func.func @transform_14(%arg0: i32, %arg1: i32) -> (i32, i32, i32) {
    %c0_i32 = arith.constant 0 : i32
    %c0_i32_0 = arith.constant 0 : i32
    %c0_i32_1 = arith.constant 0 : i32
    return %arg1, %c0_i32, %c0_i32_0 : i32, i32, i32
  }
  func.func @transform_15(%arg0: i32, %arg1: i32) -> (i32, i32, i32) {
    %c0_i32 = arith.constant 0 : i32
    %c0_i32_0 = arith.constant 0 : i32
    %c0_i32_1 = arith.constant 0 : i32
    return %arg1, %c0_i32, %c0_i32_0 : i32, i32, i32
  }
  func.func @transform_16(%arg0: i32, %arg1: i32) -> (i32, i32, i32) {
    %c0_i32 = arith.constant 0 : i32
    %c0_i32_0 = arith.constant 0 : i32
    %c0_i32_1 = arith.constant 0 : i32
    return %arg0, %c0_i32, %c0_i32_0 : i32, i32, i32
  }
}

</mosaic_0001>

<bundles_post_ra>
// kernel: tpu_custom_call.1
= control target key start
LH: loop header
LB: loop body
LE: loop exit
PB: predicated region body
PF: predicated region fallthrough
CT: control target
= control target key end

     0   :  { %s3986_s0 = inlined_call_operand.hbm [shape: f32[2,8,128], index: 0, kind: input, shape index: {}]   ;;  %s3987_s1 = inlined_call_operand.hbm [shape: f32[2,1,8], index: 1, kind: input, shape index: {}]   ;;  %s3988_s2 = inlined_call_operand.hbm [shape: f32[1,128], index: 2, kind: input, shape index: {}]   ;;  %s3989_s3 = inlined_call_operand.hbm [shape: f32[1,128], index: 3, kind: input, shape index: {}]   ;;  %s3990_s4 = inlined_call_operand.hbm [shape: bf16[2,128,384], index: 4, kind: input, shape index: {}]   ;;  %s3991_s5 = inlined_call_operand.hbm [shape: f32[2,1,384], index: 5, kind: input, shape index: {}]   ;;  %s3992_s6 = inlined_call_operand.hbm [shape: bf16[2,128,128], index: 6, kind: input, shape index: {}]   ;;  %s3993_s7 = inlined_call_operand.vmem [shape: f32[2,1,128], index: 7, kind: input, shape index: {}]   ;;  %s3994_s8 = inlined_call_operand.hbm [shape: f32[2,1,128], index: 8, kind: input, shape index: {}]   ;;  %s3995_s9 = inlined_call_operand.vmem [shape: f32[2,1,128], index: 9, kind: input, shape index: {}]   ;;  %s3996_s10 = inlined_call_operand.hbm [shape: bf16[2,128,256], index: 10, kind: input, shape index: {}]   ;;  %s3997_s11 = inlined_call_operand.vmem [shape: f32[2,1,256], index: 11, kind: input, shape index: {}]   ;;  %s3998_s12 = inlined_call_operand.hbm [shape: bf16[2,256,128], index: 12, kind: input, shape index: {}]   ;;  %s3999_s13 = inlined_call_operand.vmem [shape: f32[2,1,128], index: 13, kind: input, shape index: {}]   ;;  %s4000_s14 = inlined_call_operand.vmem [shape: f32[2,1,128], index: 14, kind: input, shape index: {}]   ;;  %s4001_s15 = inlined_call_operand.vmem [shape: f32[2,1,128], index: 15, kind: input, shape index: {}]   ;;  %s4002_s16 = inlined_call_operand.hbm [shape: f32[2,8,128], index: 16, kind: output, shape index: {}]  }
   0x1   :  { %4031 = sst [smem:[#allocation47_spill]] %s3986_s0 }
   0x2   :  { %4032 = sst [smem:[#allocation48_spill]] %s3987_s1 }
   0x3   :  { %4033 = sst [smem:[#allocation49_spill]] %s3988_s2 }
   0x4   :  { %4034 = sst [smem:[#allocation50_spill]] %s3989_s3 }
   0x5   :  { %4035 = sst [smem:[#allocation51_spill]] %s3990_s4 }
   0x6   :  { %4036 = sst [smem:[#allocation52_spill]] %s3991_s5 }
   0x7   :  { %4037 = sst [smem:[#allocation53_spill]] %s3992_s6 }
   0x8   :  { %4038 = sst [smem:[#allocation54_spill]] %s3993_s7 }
   0x9   :  { %4039 = sst [smem:[#allocation55_spill]] %s3994_s8 }
   0xa   :  { %4040 = sst [smem:[#allocation56_spill]] %s3995_s9 }
   0xb   :  { %4041 = sst [smem:[#allocation57_spill]] %s3996_s10 }
   0xc   :  { %4042 = sst [smem:[#allocation58_spill]] %s3997_s11 }
   0xd   :  { %4043 = sst [smem:[#allocation59_spill]] %s3998_s12 }
   0xe   :  { %4044 = sst [smem:[#allocation60_spill]] %s3999_s13 }
   0xf   :  { %4045 = sst [smem:[#allocation61_spill]] %s4000_s14 }
  0x10   :  { %4046 = sst [smem:[#allocation62_spill]] %s4001_s15 }
  0x11   :  { %4047 = sst [smem:[#allocation63_spill]] %s4002_s16 }
  0x12   :  { %21 = vsyncpa [#allocation3], 0 }
  0x13   :  { %23 = vsyncpa [#allocation3 + $0x1], 0 }
  0x14   :  { %24 = vsyncpa [#allocation6], 0 }
  0x15   :  { %26 = vsyncpa [#allocation6 + $0x1], 0 }
  0x16   :  { %27 = vsyncpa [#allocation9], 0 }
  0x17   :  { %28 = vsyncpa [#allocation4], 0 }
  0x18   :  { %30 = vsyncpa [#allocation4 + $0x1], 0  ;;  %s3355_s21 = smov 0   ;;  %s3357_s22 = smov 0  }
  0x19   :  { %s3359_s23 = smov 0   ;;  %s3361_s24 = smov 0  }
  0x1a   :  { %s3363_s25 = smov 0   ;;  %s3365_s26 = smov 0  }
  0x1b   :  { %s3367_s27 = smov 0   ;;  %s3369_s28 = smov 0  }
  0x1c   :  { %s3371_s29 = smov 0   ;;  %s3373_s30 = smov 0  }
  0x1d   :  { %s3375_s0 = smov 0  }
  0x1e LB: > { %4048 = sst [smem:[#allocation28_spill]] %s3219_s22  ;;  %s3409_s17 = sadd.s32 4294967295, %s3255_s0   ;;  %s3255_s0 = sphi %s3375_s0, %s36_s0   ;;  %s3251_s30 = sphi %s3373_s30, %s4129_s30   ;;  %s3247_s29 = sphi %s3371_s29, %s4128_s29   ;;  %s3243_s28 = sphi %s3369_s28, %s4127_s28   ;;  %s3239_s27 = sphi %s3367_s27, %s4126_s27   ;;  %s3235_s26 = sphi %s3365_s26, %s4125_s26   ;;  %s3231_s25 = sphi %s3363_s25, %s4124_s25   ;;  %s3227_s24 = sphi %s3361_s24, %s4123_s24   ;;  %s3223_s23 = sphi %s3359_s23, %s4122_s23   ;;  %s3219_s22 = sphi %s3357_s22, %s4121_s22   ;;  %s3215_s21 = sphi %s3355_s21, %s4120_s21  }
  0x1f   : > { %4049 = sst [smem:[#allocation29_spill]] %s3223_s23  ;;  %p162_p0 = scmp.ne.s32.totalorder %s3219_s22, %s3215_s21 }
  0x20   : > { %4050 = sst [smem:[#allocation30_spill]] %s3227_s24  ;;  %p4007_p1 = scmp.eq.s32.totalorder %s3409_s17, 0 }
  0x21   : > { %4051 = sst [smem:[#allocation31_spill]] %s3231_s25  ;;  %p472_p2 = scmp.eq.s32.totalorder %s3409_s17, 3 }
  0x22   : > { %4052 = sst [smem:[#allocation32_spill]] %s3235_s26  ;;  %p2222_p3 = scmp.ge.s32.totalorder %s3255_s0, 1 }
  0x23   : > { %4053 = sst [smem:[#allocation33_spill]] %s3239_s27  ;;  %p485_p4 = scmp.lt.s32.totalorder %s3255_s0, 5 }
  0x24   : > { %4054 = sst [smem:[#allocation34_spill]] %s3243_s28  ;;  %p3418_p5 = por %p162_p0, %p4007_p1 }
  0x25   : > { %4055 = sst [smem:[#allocation35_spill]] %s3247_s29  ;;  %p3422_p6 = pnand %p2222_p3, %p485_p4 }
  0x26   : > { %4056 = sst [smem:[#allocation36_spill]] %s3251_s30  ;;  %s3257_s28 = smov [#allocation7]  }
  0x27   : > { %4057 = sst [smem:[#allocation37_spill]] %s3255_s0  ;;  %p2615_p7 = pneg %p3422_p6 }
  0x28   : > { %4058 = sst [smem:[#allocation38_spill]] %s3409_s17  ;;  %s499_s15 = sshll.u32 %s3257_s28, 4  ;;  %s500_s15 = int_to_ptr.vmem [resolvable:$true] %s499_s15 }
  0x29   : > { %s4059_s18 = scalar_select %p3418_p5, 1, 0 }
  0x2a   : > { %s4062_s2 = sld [smem:[#allocation49_spill]]  ;;  %p3433_p8 = pnand %p2615_p7, %p4007_p1 }
  0x2b   : > { %4060 = sst [smem:[#allocation39_spill]] %s4059_s18  ;;  %s2221_s21 = sadd.s32 4294967294, %s3255_s0  }
  0x2c   : > { %s48_s28 = sadd.s32 1, %s3251_s30  ;;  %s55_s14 = sadd.s32 1, %s3235_s26 }
  0x2d   : > { %p62_p10 = scmp.ne.s32.totalorder %s3235_s26, %s3231_s25  ;;  %p4005_p11 = scmp.eq.s32.totalorder %s3255_s0, 0 }
  0x2e   : > { %p4008_p12 = scmp.ne.s32.totalorder %s3231_s25, %s3227_s24  ;;  %p156_p7 = scmp.ne.s32.totalorder %s3223_s23, %s3219_s22 }
  0x2f   : > { %p3458_p0 = por %p4005_p11, %p62_p10  ;;  %p3483_p11 = por %p472_p2, %p62_p10 }
  0x30   : > { %s497_s16 = sshll.u32 %s4062_s2, 4  ;;  %s45_s2 = sadd.s32 1, %s3247_s29  ;;  %s498_s16 = int_to_ptr.hbm [resolvable:$true] %s497_s16 }
  0x31   : > { %2618 = dma.hbm_to_vmem [thread:$0]  (!%p3433_p8), %s498_s16, 16, %s500_s15, [#allocation6]  }
  0x32   : > { %p46_p9 = scmp.ge.s32.totalorder %s45_s2, 2  ;;  %p3467_p3 = por %p4007_p1, %p4008_p12 }
  0x33   : > { %s4069_s9 = scalar_select %p3483_p11, 1, 0 }
  0x34   : > { %s4131_s2 = smov (%p46_p9, %s45_s2), 0  ;;  %s4133_s28 = smov (!%p46_p9, %s48_s28), %s3251_s30 }
  0x35   : > { %4064 = sst [smem:[#allocation40_spill]] %s4131_s2  ;;  %p50_p13 = scmp.ge.s32.totalorder %s4133_s28, 2 }
  0x36   : > { %s146_s15 = ssub.s32 %s3247_s29, %s4131_s2  ;;  %s149_s2 = sadd.s32 1, %s3223_s23 }
  0x37   : > { %s4066_s11 = scalar_select %p3467_p3, 1, 0 }
  0x38   : > { %s4135_s28 = smov (%p50_p13, %s4133_s28), 0  ;;  %p147_p4 = scmp.eq.s32.totalorder %s146_s15, 0 }
  0x39   : > { %4067 = sst [smem:[#allocation41_spill]] %s4066_s11  ;;  %s52_s13 = ssub.s32 %s3251_s30, %s4135_s28 }
  0x3a   : > { %4068 = sst [smem:[#allocation42_spill]] %s4135_s28  ;;  %p53_p9 = scmp.eq.s32.totalorder %s52_s13, 0 }
  0x3b   : > { %4070 = sst [smem:[#allocation43_spill]] %s4069_s9  ;;  %p4073_p13 = scmp.eq.s32.totalorder %s3255_s0, 0 }
  0x3c   : > { %s3488_s7 = scalar_select %p147_p4, %s3223_s23, %s149_s2  }
  0x3d   : > { %s3491_s27 = scalar_select %p53_p9, %s3235_s26, %s55_s14  }
  0x3e   : > { %4071 = sst [smem:[#allocation44_spill]] %s3488_s7  ;;  %p3495_p1 = por %p156_p7, %p4073_p13 }
  0x3f   : > { %4072 = sst [smem:[#allocation45_spill]] %s3491_s27  ;;  %p478_p12 = scmp.eq.s32.totalorder %s2221_s21, 3 }
  0x40   : > { %p2653_p5 = scmp.lt.s32.totalorder %s3255_s0, 4  ;;  %s522_s13 = sand.u32 1, %s3255_s0  }
  0x41   : > { %p4075_p2 = scmp.ne.s32.totalorder %s3231_s25, %s3227_s24  ;;  %s524_s2 = sand.u32 1, %s3235_s26  }
  0x42   : > { %s2227_s7 = sshll.u32 %s3251_s30, 3  ;;  %s2226_s14 = sshll.u32 %s524_s2, 3 }
  0x43   : > { %p3504_p10 = por %p478_p12, %p4075_p2  ;;  %s4078_s18 = sld [smem:[#allocation47_spill]] }
  0x44   : > { %s526_s17 = scalar_lea.vmem [#allocation2], %s2226_s14  ;;  %p2623_p12 = pnand %p2653_p5, %p3458_p0 }
  0x45   : > { %s4076_s28 = scalar_select %p3504_p10, 1, 0 }
  0x46   : > { %s534_s21 = sshll.u32 %s526_s17, 4  ;;  %p3521_p4 = pnand %p2653_p5, %p3495_p1  ;;  %s535_s21 = int_to_ptr.vmem [resolvable:$true] %s534_s21 }
  0x47   : > { %4077 = sst [smem:[#allocation46_spill]] %s4076_s28  ;;  %s3525_s28 = scalar_lea.sflag [#allocation3], %s522_s13 }
  0x48   : > { %s4080_s1 = sld [smem:[#allocation48_spill]]  ;;  %s544_s17 = scalar_lea.vmem [#allocation5], %s524_s2 }
  0x49   : > { %s530_s22 = scalar_lea.hbm %s4078_s18, %s2227_s7  ;;  %s551_s18 = sshll.u32 %s544_s17, 4  ;;  %s552_s18 = int_to_ptr.vmem [resolvable:$true] %s551_s18 }
  0x4a   : > { %s532_s11 = sshll.u32 %s530_s22, 4  ;;  %s3532_s16 = scalar_lea.sflag [#allocation6], %s522_s13  ;;  %s533_s11 = int_to_ptr.hbm [resolvable:$true] %s532_s11 }
  0x4b   : > { %2625 = dma.hbm_to_vmem [thread:$0]  (!%p2623_p12), %s533_s11, 128, %s535_s21, %s3525_s28  }
  0x4c   : > { %s3536_s15 = sand.u32 1, %s3223_s23   ;;  %s2584_s11 = smul.u32 192, %s3247_s29 }
  0x4d   : > { %s2583_s14 = smul.u32 192, %s3536_s15  ;;  %s4081_s4 = sld [smem:[#allocation51_spill]] }
  0x4e   : > { %s547_s22 = scalar_lea.hbm %s4080_s1, %s3251_s30  ;;  %s3258_s17 = smov 192  }
  0x4f   : > { %s549_s27 = sshll.u32 %s547_s22, 4  ;;  %s562_s22 = scalar_lea.vmem [#allocation10], %s2583_s14  ;;  %s550_s27 = int_to_ptr.hbm [resolvable:$true] %s549_s27 }
  0x50   : > { %2628 = dma.hbm_to_vmem [thread:$0]  (!%p2623_p12), %s550_s27, 16, %s552_s18, %s3532_s16  }
  0x51   : > { %s570_s13 = sshll.u32 %s562_s22, 4  ;;  %s2585_s27 = smul.u32 3, %s3536_s15  ;;  %s571_s13 = int_to_ptr.vmem [resolvable:$true] %s570_s13 }
  0x52   : > { %s3259_s18 = smov 12   ;;  %s2586_s1 = smul.u32 3, %s3247_s29 }
  0x53   : > { %s567_s2 = scalar_lea.hbm %s4081_s4, %s2584_s11  ;;  %s584_s30 = scalar_lea.vmem [#allocation11], %s2585_s27 }
  0x54   : > { %s568_s9 = sshll.u32 %s567_s2, 4  ;;  %s592_s23 = sshll.u32 %s584_s30, 4  ;;  %s569_s9 = int_to_ptr.hbm [resolvable:$true] %s568_s9  ;;  %s593_s23 = int_to_ptr.vmem [resolvable:$true] %s592_s23 }
  0x55   : > { %2631 = dma.hbm_to_vmem [thread:$0]  (!%p3521_p4), %s569_s9, 3072, %s571_s13, %s3525_s28, %s3258_s17, %s3258_s17, %s3259_s18  }
  0x56   : > { %s2229_s21 = sshll.u32 %s3536_s15, 6  ;;  %s4082_s5 = sld [smem:[#allocation52_spill]] }
  0x57   : > { %s2516_s22 = sshll.u32 %s3247_s29, 6  ;;  %s4083_s6 = sld [smem:[#allocation53_spill]] }
  0x58   : > { %s603_s30 = scalar_lea.vmem [#allocation12], %s2229_s21  ;;  %s3261_s18 = smov 4  }
  0x59   : > { %s611_s27 = sshll.u32 %s603_s30, 4  ;;  %s4084_s8 = sld [smem:[#allocation55_spill]]  ;;  %s612_s27 = int_to_ptr.vmem [resolvable:$true] %s611_s27 }
  0x5a   : > { %s630_s7 = scalar_lea.vmem [#allocation13], %s3536_s15  ;;  %s4085_s3 = sld [smem:[#allocation50_spill]] }
  0x5b   : > { %s637_s21 = sshll.u32 %s630_s7, 4  ;;  %s4086_s10 = sld [smem:[#allocation57_spill]]  ;;  %s638_s21 = int_to_ptr.vmem [resolvable:$true] %s637_s21 }
  0x5c   : > { %s588_s14 = scalar_lea.hbm %s4082_s5, %s2586_s1  ;;  %s4024_s1 = smov 64  }
  0x5d   : > { %s590_s2 = sshll.u32 %s588_s14, 4  ;;  %s608_s13 = scalar_lea.hbm %s4083_s6, %s2516_s22  ;;  %s591_s2 = int_to_ptr.hbm [resolvable:$true] %s590_s2 }
  0x5e   : > { %2634 = dma.hbm_to_vmem [thread:$0]  (!%p3521_p4), %s591_s2, 48, %s593_s23, %s3532_s16  }
  0x5f   : > { %s609_s17 = sshll.u32 %s608_s13, 4  ;;  %s633_s11 = scalar_lea.hbm %s4084_s8, %s3247_s29  ;;  %s610_s17 = int_to_ptr.hbm [resolvable:$true] %s609_s17 }
  0x60   : > { %2637 = dma.hbm_to_vmem [thread:$0]  (!%p3521_p4), %s610_s17, 1024, %s612_s27, %s3525_s28, %s4024_s1, %s4024_s1, %s3261_s18  }
  0x61   : > { %s635_s14 = sshll.u32 %s633_s11, 4  ;;  %s509_s9 = sshll.u32 %s4085_s3, 4  ;;  %s636_s14 = int_to_ptr.hbm [resolvable:$true] %s635_s14  ;;  %s510_s9 = int_to_ptr.hbm [resolvable:$true] %s509_s9 }
  0x62   : > { %2640 = dma.hbm_to_vmem [thread:$0]  (!%p3521_p4), %s636_s14, 16, %s638_s21, %s3532_s16  }
  0x63   : > { %s3262_s13 = smov [#allocation8]   ;;  %s2232_s27 = sshll.u32 %s3536_s15, 7 }
  0x64   : > { %s511_s30 = sshll.u32 %s3262_s13, 4  ;;  %s2517_s17 = sshll.u32 %s3247_s29, 7  ;;  %s512_s30 = int_to_ptr.vmem [resolvable:$true] %s511_s30 }
  0x65   : > { %2621 = dma.hbm_to_vmem [thread:$0]  (!%p3433_p8), %s510_s9, 16, %s512_s30, [#allocation9]  }
  0x66   : > { %s654_s23 = scalar_lea.vmem [#allocation14], %s2232_s27  ;;  %s659_s2 = scalar_lea.hbm %s4086_s10, %s2517_s17 }
  0x67   : > { %s662_s4 = sshll.u32 %s654_s23, 4  ;;  %s660_s21 = sshll.u32 %s659_s2, 4  ;;  %s663_s4 = int_to_ptr.vmem [resolvable:$true] %s662_s4  ;;  %s661_s21 = int_to_ptr.hbm [resolvable:$true] %s660_s21 }
  0x68   : > { %s3263_s14 = smov 128   ;;  %s3264_s22 = smov 8  }
  0x69   : > { %2643 = dma.hbm_to_vmem [thread:$0]  (!%p3521_p4), %s661_s21, 2048, %s663_s4, %s3525_s28, %s3263_s14, %s3263_s14, %s3264_s22  }
  0x6a   : > { %s4087_s12 = sld [smem:[#allocation59_spill]]  ;;  %s683_s30 = scalar_lea.vmem [#allocation15], %s2232_s27 }
  0x6b   : > { %s691_s1 = sshll.u32 %s683_s30, 4  ;;  %s4088_s23 = smov 64   ;;  %s692_s1 = int_to_ptr.vmem [resolvable:$true] %s691_s1 }
  0x6c   : > { %s4089_s11 = sld [smem:[#allocation38_spill]] (!%p3422_p6)  ;;  %s3599_s7 = sand.u32 (!%p3422_p6), 1, %s3231_s25  }
  0x6d   : > { %s4025_s27 = sshll.u32 (!%p3422_p6), %s3599_s7, 3 }
  0x6e   : > { %721 = sbr.rel (%p3422_p6) target bundleno = 2355 (0x933), region = 84  ;;  %s3606_s26 = scalar_lea.vmem (!%p3422_p6), [#allocation2], %s4025_s27 }
  0x70   : > { %s688_s20 = scalar_lea.hbm %s4087_s12, %s2517_s17 }
  0x71   : > { %s689_s9 = sshll.u32 %s688_s20, 4  ;;  %s690_s9 = int_to_ptr.hbm [resolvable:$true] %s689_s9 }
  0x72   : > { %2646 = dma.hbm_to_vmem [thread:$0]  (!%p3521_p4), %s690_s9, 2048, %s692_s1, %s3532_s16, %s4088_s23, %s4088_s23, %s3261_s18  }
  0x73   : > { %s723_s4 = sand.u32 1, %s4089_s11  }
  0x74   : > { %s3602_s17 = scalar_lea.sflag [#allocation3], %s723_s4 }
  0x75   : > { %3170 = dma.done.wait (%p3467_p3), %s3602_s17, 128  }
  0x76   : > { %3172 = vsyncadd (%p3467_p3), %s3602_s17, 4294967168  ;;  %s3614_s19 = scalar_lea.sflag [#allocation6], %s723_s4 }
  0x77   : > { %3174 = dma.done.wait (%p3467_p3), %s3614_s19, 16  }
  0x78   : > { %3176 = vsyncadd (%p3467_p3), %s3614_s19, 4294967280  ;;  %p4091_p1 = scmp.eq.s32.totalorder %s4089_s11, 0 }
  0x7a   : > { %3178 = dma.done.wait (%p4091_p1), [#allocation6], 16   ;;  %p4092_p5 = pmov %p4091_p1 }
  0x7b   : > { %p4093_p6 = pmov %p4091_p1 }
  0x7c   : > { %3180 = vsyncadd (%p4092_p5), [#allocation6], 4294967280 }
  0x7d   : > { %3182 = dma.done.wait (%p4093_p6), [#allocation9], 16   ;;  %p4094_p8 = pmov %p4091_p1 }
  0x7e   : > { %s4095_s1 = sld [smem:[#allocation28_spill]] }
  0x7f   : > { %3184 = vsyncadd (%p4094_p8), [#allocation9], 4294967280  ;;  %s4096_s18 = sld [smem:[#allocation39_spill]] }
  0x84   : > { %s3632_s2 = sand.u32 1, %s4095_s1  }
  0x85   : > { %s2587_s21 = smul.u32 192, %s3632_s2  ;;  %p4097_p0 = scmp.ne.s32.totalorder %s4096_s18, 0 }
  0x87   : > { %s3635_s14 = scalar_lea.vmem [#allocation10], %s2587_s21 }
  0x88   : > { %3186 = dma.done.wait (%p4097_p0), %s3602_s17, 3072  }
  0x89   : > { %3188 = vsyncadd (%p4097_p0), %s3602_s17, 4294964224  ;;  %s2588_s22 = smul.u32 3, %s3632_s2 }
  0x8b   : > { %s3644_s15 = scalar_lea.vmem [#allocation11], %s2588_s22 }
  0x8c   : > { %3190 = dma.done.wait (%p4097_p0), %s3614_s19, 48  }
  0x8d   : > { %3192 = vsyncadd (%p4097_p0), %s3614_s19, 4294967248  ;;  %s2242_s13 = sshll.u32 %s3632_s2, 6 }
  0x8e   : > { %s3653_s20 = scalar_lea.vmem [#allocation12], %s2242_s13 }
  0x8f   : > { %3194 = dma.done.wait (%p4097_p0), %s3602_s17, 1024  }
  0x90   : > { %3196 = vsyncadd (%p4097_p0), %s3602_s17, 4294966272 }
  0x91   : > { %3198 = dma.done.wait (%p4097_p0), %s3614_s19, 16  }
  0x92   : > { %3200 = vsyncadd (%p4097_p0), %s3614_s19, 4294967280  ;;  %s2243_s30 = sshll.u32 %s3632_s2, 7 }
  0x93   : > { %s3669_s23 = scalar_lea.vmem [#allocation14], %s2243_s30 }
  0x94   : > { %3202 = dma.done.wait (%p4097_p0), %s3602_s17, 2048  }
  0x95   : > { %3204 = vsyncadd (%p4097_p0), %s3602_s17, 4294965248  ;;  %s3677_s11 = scalar_lea.vmem [#allocation15], %s2243_s30 }
  0x96   : > { %3206 = dma.done.wait (%p4097_p0), %s3614_s19, 2048  }
  0x97   : > { %3208 = vsyncadd (%p4097_p0), %s3614_s19, 4294965248  ;;  %s4098_s28 = sld [smem:[#allocation33_spill]]  ;;  %s4105_s13 = sshll.u32 %s3599_s7, 3 }
  0x98   : > { %s4100_s30 = sld [smem:[#allocation56_spill]]  ;;  %s3717_s18 = scalar_lea.vmem [#allocation16], %s4105_s13 }
  0x99   : > { %s4101_s3 = sld [smem:[#allocation60_spill]] }
  0x9a   : > { %s4102_s10 = sld [smem:[#allocation58_spill]] }
  0x9b   : > { %s4103_s29 = sld [smem:[#allocation61_spill]] }
  0x9c   : > { %s4104_s22 = sld [smem:[#allocation62_spill]] }
  0x9d   : > { %p907_p3 = scmp.lt.s32.totalorder %s4098_s28, 1  ;;  %p2247_p7 = scmp.ne.s32.totalorder %s4098_s28, 0 }
  0x9f   : > { %s3687_s4 = scalar_select %p907_p3, %s4098_s28, 1 }
  0xa0   : > { %930 = sbr.rel (%p2247_p7) target bundleno = 433 (0x1b1), region = 128 }
  0xa1   : > { %s912_s19 = scalar_lea.vmem %s4100_s30, %s3687_s4  ;;  %s2246_s9 = sshll.u32 %s3687_s4, 1 }
  0xa2   : > { %s919_s5 = scalar_lea.vmem %s4101_s3, %s3687_s4  ;;  %s3705_s12 = scalar_lea.vmem %s4102_s10, %s2246_s9 }
  0xa3   : > { %s922_s25 = scalar_lea.vmem %s4103_s29, %s3687_s4  ;;  %s925_s0 = scalar_lea.vmem %s4104_s22, %s3687_s4 }
  0xa5   : > { %v931_v0 = vld [vmem:[%s3606_s26] sm:$0xff]  ;;  %v3265_v1 = vmov 128.0   ;;  %v2758_v21 = vld [vmem:[#allocation7] ss:$0 sm:$0xff]  ;;  %v2759_v23 = vld [vmem:[#allocation8] ss:$0 sm:$0xff] }
  0xa6   : > { %934 = vadd.xlane.f32.xlu0 %v931_v0  ;;  %2760 = vrcp.f32 %v3265_v1 }
  0xac   : > { %v2761_v2 = vpop.eup %2760 }
  0xad   : > { %v937_v3 = vmul.f32 128.0, %v2761_v2  ;;  %vm941_vm0 = vweird.f32 %v2761_v2 }
  0xaf   : > { %v938_v4 = vsub.f32 1.0, %v937_v3 }
  0xb1   : > { %v939_v5 = vmul.f32 %v2761_v2, %v938_v4 }
  0xb3   : > { %v940_v6 = vadd.f32 %v2761_v2, %v939_v5 }
  0xb5   : > { %v942_v7 = vsel %vm941_vm0, %v2761_v2, %v940_v6 }
 0x119   : > { %v935_v8 = vpop.xlane.xlu0 %934 }
 0x11a   : > { %v943_v9 = vmul.f32 %v942_v7, %v935_v8 }
 0x11c   : > { %v944_v10 = vsub.f32 %v931_v0, %v943_v9 }
 0x11e   : > { %v945_v11 = vmul.f32 %v944_v10, %v944_v10 }
 0x120   : > { %946 = vadd.xlane.f32.xlu0 %v945_v11 }
 0x193   : > { %v947_v12 = vpop.xlane.xlu0 %946 }
 0x194   : > { %v948_v13 = vmul.f32 %v947_v12, %v942_v7 }
 0x196   : > { %v949_v14 = vadd.f32 1e-12, %v948_v13 }
 0x198   : > { %2762 = vrsqrt.f32 %v949_v14  ;;  %vm956_vm2 = vweird.f32 %v949_v14 }
 0x19e   : > { %v2763_v15 = vpop.eup %2762 }
 0x19f   : > { %v951_v16 = vmul.f32 %v2763_v15, %v949_v14  ;;  %vm957_vm1 = vweird.f32 %v2763_v15 }
 0x1a0   : > { %vm958_vm3 = vmor %vm956_vm2, %vm957_vm1 }
 0x1a1   : > { %v952_v17 = vmul.f32 %v2763_v15, %v951_v16 }
 0x1a3   : > { %v953_v18 = vmul.f32 0.5, %v952_v17 }
 0x1a5   : > { %v954_v19 = vsub.f32 1.5, %v953_v18 }
 0x1a7   : > { %v955_v20 = vmul.f32 %v2763_v15, %v954_v19 }
 0x1a9   : > { %v959_v22 = vsel %vm958_vm3, %v2763_v15, %v955_v20 }
 0x1aa   : > { %v960_v24 = vmul.f32 %v959_v22, %v944_v10 }
 0x1ac   : > { %v964_v25 = vmul.f32 %v2758_v21, %v960_v24 }
 0x1ae   : > { %v968_v26 = vadd.f32 %v2759_v23, %v964_v25 }
 0x1b0   : > { %969 = vst [vmem:[%s3717_s18] sm:$0xff] %v968_v26 }
 0x1b1 PF: > { %v2334_v27 = vld [vmem:[%s3635_s14 + $0xa8] sm:$0xf]  ;;  %v2541_v28 = vld [vmem:[%s3635_s14 + $0xb0] sm:$0xf0]  ;;  %v2540_v29 = vld [vmem:[%s3635_s14 + $0xac] sm:$0xf] }
 0x1b2   : > { %v2335_v30 = vor.u32 %v2541_v28, %v2334_v27  ;;  %v2336_v31 = vld [vmem:[%s3635_s14 + $0xb4] sm:$0xf0]  ;;  %v2322_v32 = vld [vmem:[%s3635_s14 + $0x90] sm:$0xf]  ;;  %v2538_v33 = vld [vmem:[%s3635_s14 + $0x98] sm:$0xf0] }
 0x1b3   : > { %v2339_v34 = vor.u32 %v2540_v29, %v2336_v31  ;;  %v2537_v35 = vld [vmem:[%s3635_s14 + $0x94] sm:$0xf]  ;;  %v2324_v36 = vld [vmem:[%s3635_s14 + $0x9c] sm:$0xf0]  ;;  %v2323_v37 = vor.u32 %v2538_v33, %v2322_v32  ;;  %v2310_v39 = vld [vmem:[%s3635_s14 + $0x78] sm:$0xf] }
 0x1b4   : > { %1141 = vmatpush.bf16.msra.mxu0 %v2335_v30  ;;  %v2327_v38 = vor.u32 %v2537_v35, %v2324_v36  ;;  %v2535_v40 = vld [vmem:[%s3635_s14 + $0x80] sm:$0xf0]  ;;  %v2534_v41 = vld [vmem:[%s3635_s14 + $0x7c] sm:$0xf]  ;;  %v2312_v42 = vld [vmem:[%s3635_s14 + $0x84] sm:$0xf0] }
 0x1b5   : > { %1154 = vmatpush.bf16.msra.mxu1 %v2339_v34  ;;  %v2311_v43 = vor.u32 %v2535_v40, %v2310_v39  ;;  %v2315_v44 = vor.u32 %v2534_v41, %v2312_v42  ;;  %v2298_v45 = vld [vmem:[%s3635_s14 + $0x60] sm:$0xf]  ;;  %v2532_v46 = vld [vmem:[%s3635_s14 + $0x68] sm:$0xf0]  ;;  %v2531_v47 = vld [vmem:[%s3635_s14 + $0x64] sm:$0xf] }
 0x1b6   : > { %v2300_v48 = vld [vmem:[%s3635_s14 + $0x6c] sm:$0xf0]  ;;  %v2286_v49 = vld [vmem:[%s3635_s14 + $0x48] sm:$0xf]  ;;  %v2529_v50 = vld [vmem:[%s3635_s14 + $0x50] sm:$0xf0]  ;;  %v2299_v51 = vor.u32 %v2532_v46, %v2298_v45 }
 0x1b7   : > { %v2528_v52 = vld [vmem:[%s3635_s14 + $0x4c] sm:$0xf]  ;;  %v2303_v53 = vor.u32 %v2531_v47, %v2300_v48  ;;  %v2288_v54 = vld [vmem:[%s3635_s14 + $0x54] sm:$0xf0]  ;;  %v2287_v55 = vor.u32 %v2529_v50, %v2286_v49  ;;  %v2274_v57 = vld [vmem:[%s3635_s14 + $0x30] sm:$0xf] }
 0x1b8   : > { %1142 = vmatpush.bf16.msra.mxu0 %v2323_v37  ;;  %v2291_v56 = vor.u32 %v2528_v52, %v2288_v54  ;;  %v2526_v58 = vld [vmem:[%s3635_s14 + $0x38] sm:$0xf0]  ;;  %v2525_v59 = vld [vmem:[%s3635_s14 + $0x34] sm:$0xf]  ;;  %v2276_v60 = vld [vmem:[%s3635_s14 + $0x3c] sm:$0xf0] }
 0x1b9   : > { %1155 = vmatpush.bf16.msra.mxu1 %v2327_v38  ;;  %v2275_v61 = vor.u32 %v2526_v58, %v2274_v57  ;;  %v2279_v62 = vor.u32 %v2525_v59, %v2276_v60  ;;  %v2262_v63 = vld [vmem:[%s3635_s14 + $0x18] sm:$0xf]  ;;  %v2523_v0 = vld [vmem:[%s3635_s14 + $0x20] sm:$0xf0]  ;;  %v2522_v1 = vld [vmem:[%s3635_s14 + $0x1c] sm:$0xf] }
 0x1ba   : > { %v2264_v2 = vld [vmem:[%s3635_s14 + $0x24] sm:$0xf0]  ;;  %v2263_v3 = vor.u32 %v2523_v0, %v2262_v63  ;;  %v2250_v5 = vld [vmem:[%s3635_s14] sm:$0xf]  ;;  %v2520_v6 = vld [vmem:[%s3635_s14 + $0x8] sm:$0xf0] }
 0x1bb   : > { %v2267_v4 = vor.u32 %v2522_v1, %v2264_v2  ;;  %v2519_v7 = vld [vmem:[%s3635_s14 + $0x4] sm:$0xf]  ;;  %v2252_v8 = vld [vmem:[%s3635_s14 + $0xc] sm:$0xf0]  ;;  %v2251_v9 = vor.u32 %v2520_v6, %v2250_v5  ;;  %vm1222_vm4 = vcmask 261120   ;;  %s3266_s3 = smov 32  }
 0x1bc   : > { %1143 = vmatpush.bf16.msra.mxu0 %v2311_v43  ;;  %v3755_v10 = vld [vmem:[%s3717_s18] sm:$0xff]  ;;  %v2255_v11 = vor.u32 %v2519_v7, %v2252_v8  ;;  %v3764_v13 = vld [vmem:[%s3644_s15] sm:$0x7]  ;;  %s3267_s6 = smov 64   ;;  %s3268_s8 = smov 96   ;;  %vm1310_vm5 = vcmask 64512  }
 0x1bd   : > { %1156 = vmatpush.bf16.msra.mxu1 %v2315_v44  ;;  %v3759_v12 = vpack.c.bf16 %v3755_v10, %v3755_v10  ;;  %v1008_v14 = vperm.slane %v3764_v13, 1  ;;  %v1007_v17 = vperm.slane %v3764_v13, 0  ;;  %s4106_s10 = scalar_lea.vmem [#allocation5], %s3599_s7  ;;  %v2342_v46 = vld [vmem:[%s3635_s14 + $0xb0] sm:$0xf]  ;;  %vm1362_vm6 = vcmask 1043456  }
 0x1be   : > { %v3783_v40 = vld [vmem:[%s4106_s10] ss:$0 sm:$0xff]  ;;  %v2542_v47 = vld [vmem:[%s3635_s14 + $0xb8] sm:$0xf0]  ;;  %v2330_v49 = vld [vmem:[%s3635_s14 + $0x98] sm:$0xf] }
 0x1bf   : > { %v2343_v48 = vor.u32 %v2542_v47, %v2342_v46  ;;  %v2539_v50 = vld [vmem:[%s3635_s14 + $0xa0] sm:$0xf0]  ;;  %v2318_v52 = vld [vmem:[%s3635_s14 + $0x80] sm:$0xf]  ;;  %v2294_v58 = vld [vmem:[%s3635_s14 + $0x50] sm:$0xf] }
 0x1c0   : > { %1144 = vmatpush.bf16.msra.mxu0 %v2299_v51  ;;  %v2331_v51 = vor.u32 %v2539_v50, %v2330_v49  ;;  %v2530_v59 = vld [vmem:[%s3635_s14 + $0x58] sm:$0xf0]  ;;  %v2270_v0 = vld [vmem:[%s3635_s14 + $0x20] sm:$0xf]  ;;  %v2524_v1 = vld [vmem:[%s3635_s14 + $0x28] sm:$0xf0] }
 0x1c1   : > { %1157 = vmatpush.bf16.msra.mxu1 %v2303_v53  ;;  %1167 = vmatpush.bf16.msra.mxu2 %v2343_v48  ;;  %v2536_v53 = vld [vmem:[%s3635_s14 + $0x88] sm:$0xf0]  ;;  %v2295_v60 = vor.u32 %v2530_v59, %v2294_v58  ;;  %v2271_v2 = vor.u32 %v2524_v1, %v2270_v0  ;;  %vm1449_vm7 = vcmask 523264   ;;  %vm1451_vm8 = vcmask 785408   ;;  %s4107_s27 = sld [smem:[#allocation54_spill]]  ;;  %s4109_s16 = scalar_lea.vmem [#allocation13], %s3632_s2 }
 0x1c2   : > { %v2319_v54 = vor.u32 %v2536_v53, %v2318_v52  ;;  %s4114_s1 = sld [smem:[#allocation63_spill]] }
 0x1c4   : > { %1145 = vmatpush.bf16.msra.mxu0 %v2287_v55  ;;  %v2306_v55 = vld [vmem:[%s3635_s14 + $0x68] sm:$0xf] }
 0x1c5   : > { %1158 = vmatpush.bf16.msra.mxu1 %v2291_v56  ;;  %1168 = vmatpush.bf16.msra.mxu2 %v2331_v51  ;;  %v2533_v56 = vld [vmem:[%s3635_s14 + $0x70] sm:$0xf0] }
 0x1c6   : > { %v2307_v57 = vor.u32 %v2533_v56, %v2306_v55 }
 0x1c7   : > { %s4108_s26 = scalar_lea.vmem %s4107_s27, %s3687_s4 }
 0x1c8   : > { %1146 = vmatpush.bf16.msra.mxu0 %v2275_v61  ;;  %v2282_v61 = vld [vmem:[%s3635_s14 + $0x38] sm:$0xf]  ;;  %s3117_s4 = scalar_lea.hbm %s4114_s1, 16 }
 0x1c9   : > { %1159 = vmatpush.bf16.msra.mxu1 %v2279_v62  ;;  %1169 = vmatpush.bf16.msra.mxu2 %v2319_v54  ;;  %v2527_v62 = vld [vmem:[%s3635_s14 + $0x40] sm:$0xf0] }
 0x1ca   : > { %v2283_v63 = vor.u32 %v2527_v62, %v2282_v61 }
 0x1cc   : > { %1147 = vmatpush.bf16.msra.mxu0 %v2263_v3  ;;  %v2258_v3 = vld [vmem:[%s3635_s14 + $0x8] sm:$0xf] }
 0x1cd   : > { %1160 = vmatpush.bf16.msra.mxu1 %v2267_v4  ;;  %1170 = vmatpush.bf16.msra.mxu2 %v2307_v57  ;;  %v2521_v4 = vld [vmem:[%s3635_s14 + $0x10] sm:$0xf0] }
 0x1ce   : > { %v2259_v6 = vor.u32 %v2521_v4, %v2258_v3 }
 0x1d0   : > { %1148 = vmatpush.bf16.msra.mxu0 %v2251_v9 }
 0x1d1   : > { %1161 = vmatpush.bf16.msra.mxu1 %v2255_v11  ;;  %1171 = vmatpush.bf16.msra.mxu2 %v2295_v60 }
 0x1d3   : > { %1149 = vmatmul.bf16.vlgmr.msra.gmra.mxu0 %v3759_v12 }
 0x1d4   : > { %1162 = vmatmul.bf16.vlgmr.msra.gmra.mxu1 %v3759_v12 }
 0x1d5   : > { %1172 = vmatpush.bf16.msra.mxu2 %v2283_v63 }
 0x1d9   : > { %1173 = vmatpush.bf16.msra.mxu2 %v2271_v2 }
 0x1dd   : > { %1174 = vmatpush.bf16.msra.mxu2 %v2259_v6 }
 0x1e0   : > { %1175 = vmatmul.bf16.vlgmr.msra.gmra.mxu2 %v3759_v12 }
 0x250   : > { %v1150_v15 = vpop.f32.mrf.mxu0 }
 0x251   : > { %v1163_v16 = vpop.f32.mrf.mxu1  ;;  %v1151_v20 = vadd.f32 %v1150_v15, %v1007_v17 }
 0x252   : > { %v1164_v18 = vadd.f32 %v1163_v16, %v1008_v14 }
 0x253   : > { %v1190_v24 = vpack.c.bf16 %v1151_v20, %v1151_v20 }
 0x254   : > { %1201 = vrot.lane.b32.xlu2 %v1164_v18, %s3266_s3  ;;  %1198 = vrot.lane.b32.xlu1 %v1164_v18, %s3267_s6  ;;  %v1204_v19 = vpack.c.bf16 %v1164_v18, %v1164_v18 }
 0x255   : > { %1195 = vrot.lane.b32.xlu0 %v1164_v18, %s3268_s8 }
 0x256   : > { %v1227_v21 = vsel %vm1222_vm4, %v1204_v19, 0 }
 0x257   : > { %1236 = vmatpush.bf16.xpose.msra.mxu3 %v1227_v21 }
 0x258   : > { %v1152_v22 = vpop.f32.mrf.mxu0 }
 0x259   : > { %v1165_v23 = vpop.f32.mrf.mxu1 }
 0x25c   : > { %1187 = vrot.lane.b32.xlu2 %v1151_v20, %s3266_s3  ;;  %1184 = vrot.lane.b32.xlu1 %v1151_v20, %s3267_s6 }
 0x25d   : > { %1181 = vrot.lane.b32.xlu0 %v1151_v20, %s3268_s8 }
 0x25e   : > { %2344 = vmatmul.msk.bf16.vlgmr.msra.gmra.mxu3 %vm1222_vm4, %v1190_v24 }
 0x2ae   : > { %v1202_v25 = vpop.permute.xlu2 %1201 }
 0x2af   : > { %v1207_v26 = vpack.c.bf16 %v1202_v25, %v1202_v25 }
 0x2b1   : > { %v1284_v27 = vsel %vm1222_vm4, %v1207_v26, 0 }
 0x2b2   : > { %1293 = vmatpush.bf16.xpose.msrb.mxu0 %v1284_v27 }
 0x2b6   : > { %v1188_v28 = vpop.permute.xlu2 %1187 }
 0x2b7   : > { %v1193_v29 = vpack.c.bf16 %v1188_v28, %v1188_v28  ;;  %v1009_v28 = vperm.slane %v3764_v13, 2 }
 0x2b9   : > { %2347 = vmatmul.msk.bf16.vlgmr.msrb.gmra.mxu0 %vm1222_vm4, %v1193_v29  ;;  %v1176_v29 = vpop.f32.mrf.mxu2 }
 0x2c6   : > { %v1199_v30 = vpop.permute.xlu1 %1198 }
 0x2c7   : > { %v1206_v31 = vpack.c.bf16 %v1199_v30, %v1199_v30  ;;  %v1196_v32 = vpop.permute.xlu0 %1195  ;;  %v1177_v30 = vadd.f32 %v1176_v29, %v1009_v28 }
 0x2c8   : > { %v1205_v33 = vpack.c.bf16 %v1196_v32, %v1196_v32 }
 0x2c9   : > { %v1265_v34 = vsel %vm1222_vm4, %v1206_v31, 0  ;;  %v1218_v31 = vpack.c.bf16 %v1177_v30, %v1177_v30 }
 0x2ca   : > { %v1246_v35 = vsel %vm1222_vm4, %v1205_v33, 0  ;;  %v1178_v33 = vpop.f32.mrf.mxu2 }
 0x2cb   : > { %1255 = vmatpush.bf16.xpose.msrb.mxu3 %v1246_v35  ;;  %v1364_v32 = vsel %vm1362_vm6, %v1218_v31, 0 }
 0x2cc   : > { %1373 = vmatpush.bf16.msrb.mxu2 %v1364_v32 }
 0x2ce   : > { %v1185_v38 = vpop.permute.xlu1 %1184 }
 0x2cf   : > { %v1182_v36 = vpop.permute.xlu0 %1181  ;;  %v1192_v39 = vpack.c.bf16 %v1185_v38, %v1185_v38 }
 0x2d0   : > { %v1191_v37 = vpack.c.bf16 %v1182_v36, %v1182_v36 }
 0x2d2   : > { %2345 = vmatmul.msk.bf16.vlgmr.msrb.gmra.mxu3 %vm1222_vm4, %v1191_v37 }
 0x2d3   : > { %1274 = vmatpush.bf16.xpose.msra.mxu3 %v1265_v34 }
 0x2e1   : > { %v1238_v41 = vpop.f32.mrf.mxu3 }
 0x2e2   : > { %v1299_v42 = vmul.f32 0.17677669, %v1238_v41  ;;  %2346 = vmatmul.msk.bf16.vlgmr.msra.gmra.mxu3 %vm1222_vm4, %v1192_v39 }
 0x2e4   : > { %v1306_v43 = vadd.f32 %v3783_v40, %v1299_v42 }
 0x2e6   : > { %v1311_v44 = vsel %vm1310_vm5, %v1306_v43, -inf }
 0x2e7   : > { %1312 = vmax.xlane.f32.xlu0 %v1311_v44 }
 0x2e9   : > { %v1240_v45 = vpop.f32.mrf.mxu3 }
 0x336   : > { %v1295_v5 = vpop.f32.mrf.mxu0 }
 0x337   : > { %v1302_v23 = vmul.f32 0.17677669, %v1295_v5 }
 0x339   : > { %v1309_v26 = vadd.f32 %v3783_v40, %v1302_v23  ;;  %v2546_v23 = vld [vmem:[%s3653_s20 + $0x18] sm:$0xff] }
 0x33b   : > { %v1320_v27 = vsel %vm1310_vm5, %v1309_v26, -inf }
 0x33e   : > { %v1297_v7 = vpop.f32.mrf.mxu0 }
 0x355   : > { %v1257_v8 = vpop.f32.mrf.mxu3 }
 0x356   : > { %v1300_v9 = vmul.f32 0.17677669, %v1257_v8 }
 0x358   : > { %v1307_v11 = vadd.f32 %v3783_v40, %v1300_v9 }
 0x35a   : > { %v1313_v14 = vpop.xlane.xlu0 %1312  ;;  %v1314_v15 = vsel %vm1310_vm5, %v1307_v11, -inf }
 0x35b   : > { %v1323_v16 = vsub.f32 %v1306_v43, %v1313_v14  ;;  %1315 = vmax.xlane.f32.xlu1 %v1314_v15 }
 0x35d   : > { %v1327_v17 = vmul.f32 1.442695, %v1323_v16  ;;  %v1259_v18 = vpop.f32.mrf.mxu3 }
 0x35f   : > { %2771 = vpow2.f32 %v1327_v17 }
 0x365   : > { %v2772_v19 = vpop.eup %2771  ;;  %v1276_v20 = vpop.f32.mrf.mxu3 }
 0x366   : > { %v1301_v21 = vmul.f32 0.17677669, %v1276_v20  ;;  %v1335_v22 = vsel %vm1310_vm5, %v2772_v19, 0.0  ;;  %v2550_v20 = vld [vmem:[%s3653_s20 + $0x38] sm:$0xff] }
 0x367   : > { %1336 = vadd.xlane.f32.xlu0 %v1335_v22  ;;  %1522 = vmatpush.bf16.msrb.mxu1 %v2550_v20  ;;  %v2548_v22 = vld [vmem:[%s3653_s20 + $0x28] sm:$0xff] }
 0x368   : > { %v1308_v12 = vadd.f32 %v3783_v40, %v1301_v21  ;;  %v2549_v21 = vld [vmem:[%s3653_s20 + $0x30] sm:$0xff] }
 0x36a   : > { %v1317_v24 = vsel %vm1310_vm5, %v1308_v12, -inf }
 0x36b   : > { %1318 = vmax.xlane.f32.xlu2 %v1317_v24  ;;  %1523 = vmatpush.bf16.msrb.mxu1 %v2549_v21  ;;  %v2545_v24 = vld [vmem:[%s3653_s20 + $0x10] sm:$0xff] }
 0x36c   : > { %v2404_v21 = vld [vmem:[%s3669_s23 + $0x28] sm:$0xf0] }
 0x36d   : > { %v1278_v25 = vpop.f32.mrf.mxu3 }
 0x36e   : > { %v2544_v25 = vld [vmem:[%s3653_s20 + $0x8] sm:$0xff] }
 0x36f   : > { %1524 = vmatpush.bf16.msrb.mxu1 %v2548_v22 }
 0x373   : > { %1321 = vmax.xlane.f32.xlu2 %v1320_v27 }
 0x37b   : > { %1209 = vrot.lane.b32.xlu0 %v1177_v30, %s3268_s8 }
 0x3ce   : > { %v1316_v34 = vpop.xlane.xlu1 %1315 }
 0x3cf   : > { %v1324_v35 = vsub.f32 %v1307_v11, %v1316_v34  ;;  %v2765_v34 = vld [vmem:[%s4108_s26] ss:$0 sm:$0xff] }
 0x3d1   : > { %v1329_v36 = vmul.f32 1.442695, %v1324_v35 }
 0x3d3   : > { %2773 = vpow2.f32 %v1329_v36 }
 0x3d9   : > { %v2774_v37 = vpop.eup %2773 }
 0x3da   : > { %v1337_v38 = vpop.xlane.xlu0 %1336  ;;  %v1338_v39 = vsel %vm1310_vm5, %v2774_v37, 0.0 }
 0x3db   : > { %2775 = vrcp.f32 %v1337_v38  ;;  %1339 = vadd.xlane.f32.xlu1 %v1338_v39  ;;  %v3269_v39 = vmov 128.0  }
 0x3de   : > { %v1319_v13 = vpop.xlane.xlu2 %1318 }
 0x3df   : > { %v1325_v45 = vsub.f32 %v1308_v12, %v1319_v13  ;;  %v2547_v12 = vld [vmem:[%s3653_s20 + $0x20] sm:$0xff]  ;;  %v2442_v13 = vld [vmem:[%s3669_s23 + $0x70] sm:$0xf] }
 0x3e0   : > { %1525 = vmatpush.bf16.msrb.mxu1 %v2547_v12  ;;  %v2394_v12 = vld [vmem:[%s3669_s23 + $0x10] sm:$0xf] }
 0x3e1   : > { %v2776_v40 = vpop.eup %2775  ;;  %v1331_v47 = vmul.f32 1.442695, %v1325_v45 }
 0x3e2   : > { %v1351_v41 = vmul.f32 %v2776_v40, %v2772_v19  ;;  %v2566_v40 = vld [vmem:[%s3669_s23 + $0x74] sm:$0xf0] }
 0x3e4   : > { %v1355_v42 = vpack.c.bf16 %v1351_v41, %v1351_v41  ;;  %1526 = vmatpush.bf16.msrb.mxu1 %v2546_v23  ;;  %v2565_v41 = vld [vmem:[%s3669_s23 + $0x74] sm:$0xf]  ;;  %v2554_v23 = vld [vmem:[%s3669_s23 + $0x14] sm:$0xf0] }
 0x3e6   : > { %v1322_v43 = vpop.xlane.xlu2 %1321  ;;  %2348 = vmatmul.msk.bf16.vlgmr.msrb.gmra.mxu2 %vm1310_vm5, %v1355_v42  ;;  %v2443_v42 = vor.u32 %v2566_v40, %v2442_v13 }
 0x3e7   : > { %v1326_v44 = vsub.f32 %v1309_v26, %v1322_v43  ;;  %v2543_v26 = vld [vmem:[%s3653_s20] sm:$0xff] }
 0x3e8   : > { %1527 = vmatpush.bf16.msrb.mxu1 %v2545_v24  ;;  %v2444_v43 = vld [vmem:[%s3669_s23 + $0x78] sm:$0xf0]  ;;  %v2553_v24 = vld [vmem:[%s3669_s23 + $0x14] sm:$0xf] }
 0x3e9   : > { %v1333_v46 = vmul.f32 1.442695, %v1326_v44  ;;  %v2447_v44 = vor.u32 %v2565_v41, %v2444_v43 }
 0x3eb   : > { %2777 = vpow2.f32 %v1333_v46 }
 0x3ec   : > { %2779 = vpow2.f32 %v1331_v47  ;;  %1528 = vmatpush.bf16.msrb.mxu1 %v2544_v25  ;;  %v2395_v25 = vor.u32 %v2554_v23, %v2394_v12 }
 0x3ed   : > { %v1210_v52 = vpop.permute.xlu0 %1209 }
 0x3ee   : > { %v1219_v53 = vpack.c.bf16 %v1210_v52, %v1210_v52 }
 0x3f0   : > { %v1383_v54 = vsel %vm1362_vm6, %v1219_v53, 0  ;;  %1529 = vmatpush.bf16.msrb.mxu1 %v2543_v26  ;;  %v2396_v26 = vld [vmem:[%s3669_s23 + $0x18] sm:$0xf0] }
 0x3f1   : > { %v2778_v48 = vpop.eup %2777  ;;  %1392 = vmatpush.bf16.msra.mxu2 %v1383_v54  ;;  %v2434_v54 = vld [vmem:[%s3669_s23 + $0x60] sm:$0xf] }
 0x3f2   : > { %v1344_v49 = vsel %vm1310_vm5, %v2778_v48, 0.0  ;;  %v2780_v50 = vpop.eup %2779 }
 0x3f3   : > { %1345 = vadd.xlane.f32.xlu2 %v1344_v49  ;;  %v1341_v51 = vsel %vm1310_vm5, %v2780_v50, 0.0 }
 0x3f4   : > { %1212 = vrot.lane.b32.xlu1 %v1177_v30, %s3267_s6 }
 0x3f5   : > { %1676 = vmatpush.bf16.msrb.mxu2 %v2443_v42 }
 0x3fb   : > { %1342 = vadd.xlane.f32.xlu2 %v1341_v51 }
 0x413   : > { %1215 = vrot.lane.b32.xlu2 %v1177_v30, %s3266_s3 }
 0x44e   : > { %v1340_v55 = vpop.xlane.xlu1 %1339 }
 0x44f   : > { %2781 = vrcp.f32 %v1340_v55  ;;  %v2564_v55 = vld [vmem:[%s3669_s23 + $0x64] sm:$0xf0] }
 0x455   : > { %v2782_v56 = vpop.eup %2781 }
 0x456   : > { %v1352_v57 = vmul.f32 %v2782_v56, %v2774_v37  ;;  %v2563_v56 = vld [vmem:[%s3669_s23 + $0x64] sm:$0xf] }
 0x458   : > { %v1356_v58 = vpack.c.bf16 %v1352_v57, %v1352_v57  ;;  %v2435_v57 = vor.u32 %v2564_v55, %v2434_v54  ;;  %v2580_v54 = vld [vmem:[%s3677_s11 + $0x68] sm:$0xff]  ;;  %v2571_v55 = vld [vmem:[%s3677_s11 + $0x20] sm:$0xff] }
 0x45a   : > { %2349 = vmatmul.msk.bf16.vlgmr.msra.gmra.mxu2 %vm1310_vm5, %v1356_v58  ;;  %v2436_v58 = vld [vmem:[%s3669_s23 + $0x68] sm:$0xf0] }
 0x45b   : > { %1677 = vmatpush.bf16.msrb.mxu2 %v2435_v57  ;;  %v2570_v57 = vld [vmem:[%s3677_s11 + $0x18] sm:$0xff] }
 0x466   : > { %v1346_v59 = vpop.xlane.xlu2 %1345  ;;  %v1213_v60 = vpop.permute.xlu1 %1212 }
 0x467   : > { %v1220_v61 = vpack.c.bf16 %v1213_v60, %v1213_v60  ;;  %2783 = vrcp.f32 %v1346_v59  ;;  %v2439_v59 = vor.u32 %v2563_v56, %v2436_v58  ;;  %v2426_v60 = vld [vmem:[%s3669_s23 + $0x50] sm:$0xf]  ;;  %v2579_v56 = vld [vmem:[%s3677_s11 + $0x60] sm:$0xff]  ;;  %v2578_v58 = vld [vmem:[%s3677_s11 + $0x58] sm:$0xff] }
 0x469   : > { %v1402_v62 = vsel %vm1362_vm6, %v1220_v61, 0  ;;  %v1375_v63 = vpop.f32.mrf.mxu2  ;;  %v2562_v61 = vld [vmem:[%s3669_s23 + $0x54] sm:$0xf0] }
 0x46a   : > { %1411 = vmatpush.bf16.msrb.mxu3 %v1402_v62  ;;  %v2561_v62 = vld [vmem:[%s3669_s23 + $0x54] sm:$0xf] }
 0x46d   : > { %v2784_v2 = vpop.eup %2783 }
 0x46e   : > { %v1343_v0 = vpop.xlane.xlu2 %1342  ;;  %v1354_v6 = vmul.f32 %v2784_v2, %v2778_v48  ;;  %1689 = vmatpush.bf16.msra.mxu3 %v2447_v44  ;;  %v2418_v2 = vld [vmem:[%s3669_s23 + $0x40] sm:$0xf] }
 0x46f   : > { %2785 = vrcp.f32 %v1343_v0  ;;  %v2428_v0 = vld [vmem:[%s3669_s23 + $0x58] sm:$0xf0]  ;;  %v2766_v44 = vld [vmem:[%s4109_s16] ss:$0 sm:$0xff] }
 0x470   : > { %v1358_v11 = vpack.c.bf16 %v1354_v6, %v1354_v6  ;;  %2787 = vrcp.f32 %v3269_v39  ;;  %v2420_v6 = vld [vmem:[%s3669_s23 + $0x48] sm:$0xf0] }
 0x471   : > { %v1377_v1 = vpop.f32.mrf.mxu2 }
 0x472   : > { %1690 = vmatpush.bf16.msra.mxu3 %v2439_v59  ;;  %v2431_v1 = vor.u32 %v2561_v62, %v2428_v0  ;;  %v2569_v59 = vld [vmem:[%s3677_s11 + $0x10] sm:$0xff]  ;;  %v2576_v62 = vld [vmem:[%s3677_s11 + $0x48] sm:$0xff]  ;;  %v2575_v0 = vld [vmem:[%s3677_s11 + $0x40] sm:$0xff] }
 0x475   : > { %v2786_v3 = vpop.eup %2785 }
 0x476   : > { %v1353_v4 = vmul.f32 %v2786_v3, %v2780_v50  ;;  %v1216_v5 = vpop.permute.xlu2 %1215  ;;  %v2788_v45 = vpop.eup %2787  ;;  %1691 = vmatpush.bf16.msra.mxu3 %v2431_v1  ;;  %v2560_v3 = vld [vmem:[%s3669_s23 + $0x44] sm:$0xf0]  ;;  %v1590_v1 = vld [vmem:[%s3705_s12] sm:$0x3] }
 0x477   : > { %v1221_v7 = vpack.c.bf16 %v1216_v5, %v1216_v5  ;;  %v1541_v46 = vmul.f32 128.0, %v2788_v45  ;;  %vm1545_vm9 = vweird.f32 %v2788_v45  ;;  %v2419_v5 = vor.u32 %v2560_v3, %v2418_v2 }
 0x478   : > { %v1357_v8 = vpack.c.bf16 %v1353_v4, %v1353_v4  ;;  %v2559_v4 = vld [vmem:[%s3669_s23 + $0x44] sm:$0xf]  ;;  %v1592_v2 = vperm.slane %v1590_v1, 0  ;;  %v1593_v3 = vperm.slane %v1590_v1, 1 }
 0x479   : > { %v1421_v9 = vsel %vm1362_vm6, %v1221_v7, 0  ;;  %v1542_v47 = vsub.f32 1.0, %v1541_v46  ;;  %v2423_v7 = vor.u32 %v2559_v4, %v2420_v6 }
 0x47a   : > { %2350 = vmatmul.msk.bf16.vlgmr.msrb.gmra.mxu3 %vm1310_vm5, %v1357_v8  ;;  %1430 = vmatpush.bf16.msra.mxu0 %v1421_v9  ;;  %v2410_v8 = vld [vmem:[%s3669_s23 + $0x30] sm:$0xf]  ;;  %v2558_v9 = vld [vmem:[%s3669_s23 + $0x34] sm:$0xf0] }
 0x47b   : > { %1692 = vmatpush.bf16.msra.mxu3 %v2423_v7 }
 0x47d   : > { %2351 = vmatmul.msk.bf16.vlgmr.msra.gmra.mxu0 %vm1310_vm5, %v1358_v11  ;;  %v2557_v11 = vld [vmem:[%s3669_s23 + $0x34] sm:$0xf] }
 0x4dd   : > { %v1394_v14 = vpop.f32.mrf.mxu2 }
 0x4de   : > { %1437 = vrot.lane.b32.xlu0 %v1394_v14, %s3266_s3  ;;  %v2411_v14 = vor.u32 %v2558_v9, %v2410_v8 }
 0x4e5   : > { %v1396_v15 = vpop.f32.mrf.mxu2 }
 0x4e6   : > { %v2412_v15 = vld [vmem:[%s3669_s23 + $0x38] sm:$0xf0] }
 0x4fa   : > { %v1432_v16 = vpop.f32.mrf.mxu0 }
 0x4fb   : > { %1445 = vrot.lane.b32.xlu0 %v1432_v16, %s3268_s8  ;;  %v2415_v16 = vor.u32 %v2557_v11, %v2412_v15  ;;  %s1925_s8 = sshll.u32 %s3717_s18, 4  ;;  %s1926_s8 = int_to_ptr.vmem [resolvable:$true] %s1925_s8 }
 0x4fd   : > { %v1413_v17 = vpop.f32.mrf.mxu3  ;;  %1693 = vmatpush.bf16.msra.mxu3 %v2415_v16 }
 0x4fe   : > { %1441 = vrot.lane.b32.xlu1 %v1413_v17, %s3267_s6  ;;  %v2402_v17 = vld [vmem:[%s3669_s23 + $0x20] sm:$0xf] }
 0x502   : > { %v1434_v18 = vpop.f32.mrf.mxu0 }
 0x503   : > { %v2556_v18 = vld [vmem:[%s3669_s23 + $0x24] sm:$0xf0] }
 0x504   : > { %v2403_v20 = vor.u32 %v2556_v18, %v2402_v17 }
 0x505   : > { %v1415_v19 = vpop.f32.mrf.mxu3 }
 0x506   : > { %v2555_v19 = vld [vmem:[%s3669_s23 + $0x24] sm:$0xf] }
 0x507   : > { %v2407_v22 = vor.u32 %v2555_v19, %v2404_v21 }
 0x509   : > { %1694 = vmatpush.bf16.msra.mxu3 %v2407_v22 }
 0x550   : > { %v1438_v27 = vpop.permute.xlu0 %1437 }
 0x551   : > { %v1448_v28 = vsel %vm1222_vm4, %v1375_v63, %v1438_v27  ;;  %v2427_v63 = vor.u32 %v2562_v61, %v2426_v60  ;;  %v2399_v27 = vor.u32 %v2553_v24, %v2396_v26  ;;  %v2577_v60 = vld [vmem:[%s3677_s11 + $0x50] sm:$0xff]  ;;  %v2568_v61 = vld [vmem:[%s3677_s11 + $0x8] sm:$0xff] }
 0x553   : > { %1678 = vmatpush.bf16.msrb.mxu2 %v2427_v63  ;;  %1695 = vmatpush.bf16.msra.mxu3 %v2399_v27  ;;  %v2567_v63 = vld [vmem:[%s3677_s11] sm:$0xff] }
 0x557   : > { %1679 = vmatpush.bf16.msrb.mxu2 %v2419_v5 }
 0x55b   : > { %1680 = vmatpush.bf16.msrb.mxu2 %v2411_v14 }
 0x55f   : > { %1681 = vmatpush.bf16.msrb.mxu2 %v2403_v20 }
 0x563   : > { %1682 = vmatpush.bf16.msrb.mxu2 %v2395_v25 }
 0x56d   : > { %v1446_v30 = vpop.permute.xlu0 %1445 }
 0x570   : > { %v1442_v29 = vpop.permute.xlu1 %1441 }
 0x571   : > { %v1450_v31 = vsel %vm1449_vm7, %v1448_v28, %v1442_v29  ;;  %v2386_v28 = vld [vmem:[%s3669_s23] sm:$0xf]  ;;  %v2552_v29 = vld [vmem:[%s3669_s23 + $0x4] sm:$0xf0] }
 0x572   : > { %v1452_v32 = vsel %vm1451_vm8, %v1450_v31, %v1446_v30  ;;  %v2551_v30 = vld [vmem:[%s3669_s23 + $0x4] sm:$0xf]  ;;  %v2387_v31 = vor.u32 %v2552_v29, %v2386_v28 }
 0x573   : > { %v1453_v33 = vpack.c.bf16 %v1452_v32, %v1452_v32  ;;  %v2388_v32 = vld [vmem:[%s3669_s23 + $0x8] sm:$0xf0]  ;;  %s4112_s23 = sld [smem:[#allocation34_spill]] }
 0x574   : > { %1683 = vmatpush.bf16.msrb.mxu2 %v2387_v31 }
 0x575   : > { %1530 = vmatmul.bf16.vlgmr.msrb.gmra.mxu1 %v1453_v33  ;;  %v2391_v33 = vor.u32 %v2551_v30, %v2388_v32  ;;  %v2768_v32 = vld [vmem:[%s919_s5] ss:$0 sm:$0xff] }
 0x577   : > { %1696 = vmatpush.bf16.msra.mxu3 %v2391_v33 }
 0x579   : > { %s2513_s5 = sshll.u32 %s4112_s23, 3 }
 0x57a   : > { %s1923_s21 = scalar_lea.hbm %s4114_s1, %s2513_s5 }
 0x57b   : > { %s1927_s10 = sshll.u32 %s1923_s21, 4  ;;  %s1928_s10 = int_to_ptr.hbm [resolvable:$true] %s1927_s10 }
 0x57c   : > { %s3111_s24 = sshra.s32 %s1928_s10, 4  ;;  %s3112_s24 = int_to_ptr.hbm [resolvable:$true] %s3111_s24 }
 0x57d   : > { %s3113_s29 = scalar_lea.hbm %s3112_s24, 8  ;;  %p3118_p12 = scmp.lt.s32.totalorder %s3112_s24, %s4114_s1 }
 0x57e   : > { %p3114_p9 = scmp.ne.s32.totalorder %s3112_s24, %s3113_s29  ;;  %p3119_p4 = scmp.lt.s32.totalorder %s3117_s4, %s3113_s29 }
 0x580   : > { %p3115_p13 = pnand %p3114_p9, %p3483_p11  ;;  %p3120_p1 = por %p3119_p4, %p3118_p12 }
 0x582   : > { %p3116_p2 = pneg %p3115_p13 }
 0x584   : > { %p3121_p5 = pnand %p3120_p1, %p3116_p2 }
 0x5f2   : > { %v1531_v35 = vpop.f32.mrf.mxu1 }
 0x5f3   : > { %v1532_v36 = vadd.f32 %v2765_v34, %v1531_v35  ;;  %v2574_v34 = vld [vmem:[%s3677_s11 + $0x38] sm:$0xff] }
 0x5f4   : > { %v2582_v35 = vld [vmem:[%s3677_s11 + $0x78] sm:$0xff]  ;;  %1854 = vmatpush.bf16.msrb.mxu0 %v2574_v34 }
 0x5f5   : > { %v1535_v37 = vadd.f32 %v1532_v36, %v3755_v10  ;;  %v1543_v10 = vmul.f32 %v2788_v45, %v1542_v47  ;;  %1867 = vmatpush.bf16.msra.mxu1 %v2582_v35  ;;  %v2767_v47 = vld [vmem:[%s912_s19] ss:$0 sm:$0xff] }
 0x5f7   : > { %1538 = vadd.xlane.f32.xlu1 %v1535_v37  ;;  %v1544_v48 = vadd.f32 %v2788_v45, %v1543_v10 }
 0x5f9   : > { %v3849_v49 = vsel %vm1545_vm9, %v2788_v45, %v1544_v48 }
 0x5fa   : > { %v1533_v38 = vpop.f32.mrf.mxu1 }
 0x66a   : > { %v1539_v50 = vpop.xlane.xlu1 %1538 }
 0x66b   : > { %v1547_v51 = vmul.f32 %v3849_v49, %v1539_v50 }
 0x66d   : > { %v3852_v52 = vsub.f32 %v1535_v37, %v1547_v51  ;;  %v2573_v51 = vld [vmem:[%s3677_s11 + $0x30] sm:$0xff] }
 0x66e   : > { %1855 = vmatpush.bf16.msrb.mxu0 %v2573_v51 }
 0x66f   : > { %v1549_v53 = vmul.f32 %v3852_v52, %v3852_v52 }
 0x671   : > { %1550 = vadd.xlane.f32.xlu0 %v1549_v53  ;;  %v2581_v53 = vld [vmem:[%s3677_s11 + $0x70] sm:$0xff] }
 0x672   : > { %1868 = vmatpush.bf16.msra.mxu1 %v2581_v53 }
 0x676   : > { %1869 = vmatpush.bf16.msra.mxu1 %v2580_v54  ;;  %v2770_v54 = vld [vmem:[%s925_s0] ss:$0 sm:$0xff] }
 0x67a   : > { %1870 = vmatpush.bf16.msra.mxu1 %v2579_v56 }
 0x67e   : > { %1871 = vmatpush.bf16.msra.mxu1 %v2578_v58 }
 0x682   : > { %1872 = vmatpush.bf16.msra.mxu1 %v2577_v60 }
 0x686   : > { %1873 = vmatpush.bf16.msra.mxu1 %v2576_v62 }
 0x68a   : > { %1874 = vmatpush.bf16.msra.mxu1 %v2575_v0 }
 0x6e4   : > { %v1551_v36 = vpop.xlane.xlu0 %1550 }
 0x6e5   : > { %v1552_v37 = vmul.f32 %v1551_v36, %v3849_v49 }
 0x6e7   : > { %v1553_v38 = vadd.f32 1e-12, %v1552_v37 }
 0x6e9   : > { %2789 = vrsqrt.f32 %v1553_v38  ;;  %vm1560_vm11 = vweird.f32 %v1553_v38 }
 0x6ef   : > { %v2790_v39 = vpop.eup %2789 }
 0x6f0   : > { %v1555_v13 = vmul.f32 %v2790_v39, %v1553_v38  ;;  %vm1561_vm10 = vweird.f32 %v2790_v39 }
 0x6f1   : > { %vm1562_vm12 = vmor %vm1560_vm11, %vm1561_vm10 }
 0x6f2   : > { %v1556_v40 = vmul.f32 %v2790_v39, %v1555_v13 }
 0x6f4   : > { %v1557_v41 = vmul.f32 0.5, %v1556_v40 }
 0x6f6   : > { %v1558_v42 = vsub.f32 1.5, %v1557_v41 }
 0x6f8   : > { %v1559_v43 = vmul.f32 %v2790_v39, %v1558_v42 }
 0x6fa   : > { %v1563_v45 = vsel %vm1562_vm12, %v2790_v39, %v1559_v43 }
 0x6fb   : > { %v1564_v46 = vmul.f32 %v1563_v45, %v3852_v52  ;;  %v2572_v52 = vld [vmem:[%s3677_s11 + $0x28] sm:$0xff] }
 0x6fc   : > { %1856 = vmatpush.bf16.msrb.mxu0 %v2572_v52 }
 0x6fd   : > { %v1568_v10 = vmul.f32 %v2766_v44, %v1564_v46 }
 0x6ff   : > { %v3895_v48 = vadd.f32 %v2767_v47, %v1568_v10 }
 0x700   : > { %1857 = vmatpush.bf16.msrb.mxu0 %v2571_v55 }
 0x701   : > { %v1573_v50 = vpack.c.bf16 %v3895_v48, %v3895_v48 }
 0x703   : > { %1684 = vmatmul.bf16.vlgmr.msrb.gmra.mxu2 %v1573_v50  ;;  %1697 = vmatmul.bf16.vlgmr.msra.gmra.mxu3 %v1573_v50 }
 0x704   : > { %1858 = vmatpush.bf16.msrb.mxu0 %v2570_v57 }
 0x708   : > { %1859 = vmatpush.bf16.msrb.mxu0 %v2569_v59 }
 0x70c   : > { %1860 = vmatpush.bf16.msrb.mxu0 %v2568_v61 }
 0x710   : > { %1861 = vmatpush.bf16.msrb.mxu0 %v2567_v63 }
 0x786   : > { %v1685_v4 = vpop.f32.mrf.mxu2  ;;  %v1698_v5 = vpop.f32.mrf.mxu3 }
 0x787   : > { %v1686_v6 = vadd.f32 %v1685_v4, %v1592_v2  ;;  %v1699_v7 = vadd.f32 %v1698_v5, %v1593_v3 }
 0x789   : > { %v1702_v8 = vmul.f32 %v1686_v6, %v1686_v6  ;;  %v1703_v9 = vmul.f32 %v1699_v7, %v1699_v7 }
 0x78b   : > { %v1704_v11 = vmul.f32 %v1702_v8, %v1686_v6  ;;  %v1705_v14 = vmul.f32 %v1703_v9, %v1699_v7 }
 0x78d   : > { %v1706_v15 = vmul.f32 0.044715, %v1704_v11  ;;  %v1707_v16 = vmul.f32 0.044715, %v1705_v14 }
 0x78e   : > { %v1687_v17 = vpop.f32.mrf.mxu2  ;;  %v1700_v18 = vpop.f32.mrf.mxu3 }
 0x78f   : > { %v1708_v19 = vadd.f32 %v1706_v15, %v1686_v6  ;;  %v1709_v20 = vadd.f32 %v1707_v16, %v1699_v7 }
 0x791   : > { %v1710_v21 = vmul.f32 0.7978846, %v1708_v19  ;;  %v1711_v22 = vmul.f32 0.7978846, %v1709_v20 }
 0x793   : > { %2791 = vtanh.f32 %v1710_v21 }
 0x794   : > { %2793 = vtanh.f32 %v1711_v22 }
 0x799   : > { %v2792_v12 = vpop.eup %2791 }
 0x79a   : > { %v2794_v23 = vpop.eup %2793  ;;  %v1714_v24 = vadd.f32 1.0, %v2792_v12 }
 0x79b   : > { %v1715_v25 = vadd.f32 1.0, %v2794_v23 }
 0x79c   : > { %v1716_v26 = vmul.f32 0.5, %v1714_v24 }
 0x79d   : > { %v1717_v27 = vmul.f32 0.5, %v1715_v25 }
 0x79e   : > { %v1718_v28 = vmul.f32 %v1716_v26, %v1686_v6 }
 0x79f   : > { %v1719_v29 = vmul.f32 %v1717_v27, %v1699_v7 }
 0x7a0   : > { %v1720_v30 = vpack.c.bf16 %v1718_v28, %v1718_v28 }
 0x7a1   : > { %v1721_v31 = vpack.c.bf16 %v1719_v29, %v1719_v29 }
 0x7a2   : > { %1862 = vmatmul.bf16.vlgmr.msrb.gmra.mxu0 %v1720_v30 }
 0x7a3   : > { %1875 = vmatmul.bf16.vlgmr.msra.gmra.mxu1 %v1721_v31 }
 0x81f   : > { %v1863_v33 = vpop.f32.mrf.mxu0 }
 0x820   : > { %v1864_v34 = vadd.f32 %v2768_v32, %v1863_v33  ;;  %v1876_v35 = vpop.f32.mrf.mxu1 }
 0x822   : > { %v1877_v36 = vadd.f32 %v1876_v35, %v1864_v34 }
 0x824   : > { %v1880_v37 = vadd.f32 %v1877_v36, %v3895_v48 }
 0x826   : > { %1883 = vadd.xlane.f32.xlu2 %v1880_v37 }
 0x827   : > { %v1865_v38 = vpop.f32.mrf.mxu0 }
 0x828   : > { %v1878_v39 = vpop.f32.mrf.mxu1 }
 0x899   : > { %v1884_v13 = vpop.xlane.xlu2 %1883 }
 0x89a   : > { %v1885_v40 = vmul.f32 %v1884_v13, %v3849_v49 }
 0x89c   : > { %v1886_v41 = vsub.f32 %v1880_v37, %v1885_v40 }
 0x89e   : > { %v1887_v42 = vmul.f32 %v1886_v41, %v1886_v41 }
 0x8a0   : > { %1888 = vadd.xlane.f32.xlu1 %v1887_v42 }
 0x913   : > { %v1889_v43 = vpop.xlane.xlu1 %1888 }
 0x914   : > { %v1890_v44 = vmul.f32 %v1889_v43, %v3849_v49  ;;  %v2769_v49 = vld [vmem:[%s922_s25] ss:$0 sm:$0xff]  ;;  %s1913_s25 = scalar_lea.sflag [#allocation4], %s3599_s7 }
 0x916   : > { %v1891_v45 = vadd.f32 1e-12, %v1890_v44 }
 0x918   : > { %2795 = vrsqrt.f32 %v1891_v45  ;;  %vm1898_vm14 = vweird.f32 %v1891_v45 }
 0x91e   : > { %v2796_v46 = vpop.eup %2795 }
 0x91f   : > { %v1893_v47 = vmul.f32 %v2796_v46, %v1891_v45  ;;  %vm1899_vm13 = vweird.f32 %v2796_v46 }
 0x920   : > { %vm1900_vm15 = vmor %vm1898_vm14, %vm1899_vm13 }
 0x921   : > { %v1894_v10 = vmul.f32 %v2796_v46, %v1893_v47 }
 0x923   : > { %v1895_v48 = vmul.f32 0.5, %v1894_v10 }
 0x925   : > { %v1896_v50 = vsub.f32 1.5, %v1895_v48 }
 0x927   : > { %v1897_v51 = vmul.f32 %v2796_v46, %v1896_v50 }
 0x929   : > { %v1901_v53 = vsel %vm1900_vm15, %v2796_v46, %v1897_v51 }
 0x92a   : > { %v1902_v52 = vmul.f32 %v1901_v53, %v1886_v41 }
 0x92c   : > { %v1906_v55 = vmul.f32 %v2769_v49, %v1902_v52 }
 0x92e   : > { %v1910_v56 = vadd.f32 %v2770_v54, %v1906_v55 }
 0x930   : > { %1911 = vst [vmem:[%s3717_s18] sm:$0xff] %v1910_v56 }
 0x931   : > { %3124 = shalt.err (!%p3121_p5)
}
 0x932   : > { %2613 = dma.vmem_to_hbm [thread:$0]  (%p3483_p11), %s1926_s8, 128, %s1928_s10, %s1913_s25  }
 0x933 PF: > { %s4117_s7 = sld [smem:[#allocation37_spill]] }
 0x934   : > { %s4118_s18 = sld [smem:[#allocation30_spill]] }
 0x939   : > { %p2656_p6 = scmp.ge.s32.totalorder %s4117_s7, 2 }
 0x93a   : > { %s1939_s15 = sand.u32 1, %s4118_s18  }
 0x93b   : > { %p2648_p8 = pnand %p2656_p6, %p3504_p10  ;;  %s1940_s20 = scalar_lea.sflag [#allocation4], %s1939_s15 }
 0x93d   : > { %p2649_p0 = pneg %p2648_p8 }
 0x93f   : > { %3210 = dma.done.wait (%p2649_p0), %s1940_s20, 128  }
 0x940   : > { %3212 = vsyncadd (%p2649_p0), %s1940_s20, 4294967168  ;;  %s36_s0 = sadd.s32 1, %s4117_s7   ;;  %s4120_s21 = sld [smem:[#allocation28_spill]] }
 0x941   : > { %p33_p3 = scmp.ge.s32.totalorder %s36_s0, 6   ;;  %s4121_s22 = sld [smem:[#allocation29_spill]] }
 0x942   : > { %s4122_s23 = sld [smem:[#allocation44_spill]] }
 0x943   : > { %s4123_s24 = sld [smem:[#allocation31_spill]] }
 0x944   : > { %s4124_s25 = sld [smem:[#allocation32_spill]] }
 0x945   : > { %s4125_s26 = sld [smem:[#allocation45_spill]]  ;;  %35 = sbr.rel (!%p33_p3) target bundleno = 30 (0x1e), region = 238 }
 0x946   : > { %s4126_s27 = sld [smem:[#allocation35_spill]] }
 0x947   : > { %s4127_s28 = sld [smem:[#allocation36_spill]] }
 0x948   : > { %s4128_s29 = sld [smem:[#allocation40_spill]] }
 0x949   : > { %s4129_s30 = sld [smem:[#allocation42_spill]] }
 0x94a   :  { %1946 = vsyncpa [#allocation3], 1 }
 0x94b   :  { %1948 = vsyncpa [#allocation3 + $0x1], 1 }
 0x94c   :  { %1949 = vsyncpa [#allocation6], 1 }
 0x94d   :  { %1951 = vsyncpa [#allocation6 + $0x1], 1 }
 0x94e   :  { %1952 = vsyncpa [#allocation9], 1 }
 0x94f   :  { %1953 = vsyncpa [#allocation4], 1 }
 0x950   :  { %1955 = vsyncpa [#allocation4 + $0x1], 1 }

</bundles_post_ra>
